<compile_context>
chip_gen: v7x
topology: tpu7x:2x2x1
jax: 0.10.0
libtpu: 0.0.40
codegen_flags: <defaults>
</compile_context>

<pallas_src>
import functools
import math

import jax
import jax.numpy as jnp
from jax.experimental import pallas as pl
from jax.experimental.pallas import tpu as pltpu


def _round_up(x, m):
    return ((x + m - 1) // m) * m


def _pick_tile(total, cap):
    """Largest multiple of 128 dividing `total` (a multiple of 128) that is <= cap."""
    best = 128
    t = 128
    limit = min(total, max(cap, 128))
    while t <= limit:
        if total % t == 0:
            best = t
        t += 128
    return best


def _mha_kernel(q_ref, kT_ref, vf_ref, bias_ref, out_ref, m_sc, l_sc, acc_sc,
                *, masked, n_valid_keys, padded_keys):
    """One (batch, Q-tile, KV-tile) grid cell of fused multi-head attention.

    q_ref   : (1, H, TQ, C)   VMEM bf16   queries, pre-scaled by 1/sqrt(d_k)
    kT_ref  : (1, H, C, TKV)  VMEM bf16   keys, pre-transposed (lane-dense)
    vf_ref  : (1, H, TKV)     VMEM f32    V folded with proj_z weight and proj_w weight
    bias_ref: (1,)            SMEM f32    bz * sum(ww) + bw
    out_ref : (1, 1, TQ)      VMEM f32    lane-dense output row (written on last KV step)
    m_sc/l_sc/acc_sc : (H, TQ) VMEM f32   running max / denom / weighted-value accum
    """
    qi = pl.program_id(1)
    kv = pl.program_id(2)
    n_kv = pl.num_programs(2)
    H = q_ref.shape[1]
    TQ = q_ref.shape[2]
    TKV = kT_ref.shape[3]

    @pl.when(kv == 0)
    def _init():
        m_sc[...] = jnp.full((H, TQ), -jnp.inf, jnp.float32)
        l_sc[...] = jnp.zeros((H, TQ), jnp.float32)
        acc_sc[...] = jnp.zeros((H, TQ), jnp.float32)

    q_row0 = qi * TQ
    kv_col0 = kv * TKV

    def compute():
        q = q_ref[0]        # (H, TQ, C)  bf16
        kT = kT_ref[0]      # (H, C, TKV) bf16
        vf = vf_ref[0]      # (H, TKV)    f32

        # scores: all heads in one batched MXU matmul, f32 accumulate.
        # (1/sqrt(d_k) already folded into q in the wrapper.)
        s = jnp.einsum("htc,hck->htk", q, kT,
                       preferred_element_type=jnp.float32)         # (H, TQ, TKV)

        if masked:
            # torch subsequent_mask: keep lower triangle (row >= col), fill -1e9.
            # Note: this also excludes zero-padded key columns (col >= n_valid_keys)
            # for all valid query rows. Off/below-diagonal tiles could skip the
            # compare+select entirely; kept unconditional for simplicity.
            row = q_row0 + jax.lax.broadcasted_iota(jnp.int32, (TQ, TKV), 0)
            col = kv_col0 + jax.lax.broadcasted_iota(jnp.int32, (TQ, TKV), 1)
            s = jnp.where((row >= col)[None, :, :], s, -1.0e9)
        elif padded_keys:
            # Unmasked attention: exclude the zero-padded key columns.
            col = kv_col0 + jax.lax.broadcasted_iota(jnp.int32, (TQ, TKV), 1)
            s = jnp.where((col < n_valid_keys)[None, :, :], s, -1.0e9)

        # Online (flash-style) softmax update; probabilities are never materialized:
        # the exp block is reduced directly against the folded V row.
        m_prev = m_sc[...]                                         # (H, TQ)
        m_new = jnp.maximum(m_prev, jnp.max(s, axis=-1))           # (H, TQ)
        alpha = jnp.exp(m_prev - m_new)                            # (H, TQ)
        e = jnp.exp(s - m_new[:, :, None])                         # (H, TQ, TKV)
        l_sc[...] = alpha * l_sc[...] + jnp.sum(e, axis=-1)
        acc_sc[...] = alpha * acc_sc[...] + jnp.sum(e * vf[:, None, :], axis=-1)
        m_sc[...] = m_new
        # TODO(synk): nn.Dropout omitted -- eval-mode identity (training dropout is stochastic).

    if masked:
        # Skip KV tiles that lie entirely above the causal diagonal for this Q tile.
        @pl.when(kv_col0 < q_row0 + TQ)
        def _():
            compute()
    else:
        compute()

    @pl.when(kv == n_kv - 1)
    def _finalize():
        # Normalize once, on an (H, TQ) row (EUP reciprocal), then mix heads + bias.
        z = acc_sc[...] * pl.reciprocal(l_sc[...], approx=True)            # (H, TQ)
        out_ref[0] = jnp.sum(z, axis=0, keepdims=True) + bias_ref[0]        # (1, TQ)


def init_params(key, heads, d_model, c1):
    # Deterministic synthetic init (shapes follow the nn.Module __init__).
    # NOTE: torch's get_clones() deep-copies one SelfAttention, so all heads would start
    # with identical weights; we use distinct per-head weights (same forward math).
    ks = jax.random.split(key, 10)
    s = 0.25
    f32 = jnp.float32
    return {
        "Wq": jax.random.normal(ks[0], (heads, d_model, c1 * d_model), f32) * s,
        "bq": jax.random.normal(ks[1], (heads, c1 * d_model), f32) * s,
        "Wk": jax.random.normal(ks[2], (heads, d_model, c1 * d_model), f32) * s,
        "bk": jax.random.normal(ks[3], (heads, c1 * d_model), f32) * s,
        "Wv": jax.random.normal(ks[4], (heads, d_model, c1 * d_model), f32) * s,
        "bv": jax.random.normal(ks[5], (heads, c1 * d_model), f32) * s,
        "wz": jax.random.normal(ks[6], (1, c1), f32) * s,        # proj_z: Linear(c1, 1)
        "bz": jax.random.normal(ks[7], (), f32) * s,
        "ww": jax.random.normal(ks[8], (heads,), f32) * s,       # proj_w: Linear(heads, 1)
        "bw": jax.random.normal(ks[9], (), f32) * s,
    }


def _project_qkv(enc, params):
    """Glue (plain JAX): per-head Linear projections + torch-style reshape to (B,H,L,c1)."""
    B, S, d = enc.shape
    H, _, cd = params["Wq"].shape
    C = cd // d
    L = S * d

    def proj(W, b):
        y = jnp.einsum("bsi,hio->bhso", enc, W) + b[None, :, None, :]  # (B, H, S, c1*d)
        return y.reshape(B, H, L, C)  # == torch .reshape(batch, 1, -1, c1) + cat over heads

    return (proj(params["Wq"], params["bq"]),
            proj(params["Wk"], params["bk"]),
            proj(params["Wv"], params["bv"]))


def _prepare_inputs(enc, params):
    """Glue (plain JAX): fold proj_z/proj_w into V, fold 1/sqrt(d_k) into Q, pre-transpose K,
    cast Q/K to bf16, and pad Q-rows / K-cols to multiples of 128 (lane-dense tiles)."""
    Q, K, V = _project_qkv(enc, params)                          # (B, H, L, C) f32
    B, H, L, C = Q.shape
    wz = params["wz"][0]                                         # (C,)
    # Exact folding: out = sum_h ww[h]*(softmax_h @ (V_h @ wz) + bz) + bw
    vfold = (jnp.einsum("bhlc,c->bhl", V, wz)
             * params["ww"][None, :, None]).astype(jnp.float32)  # (B, H, L)
    bias = (params["bz"] * jnp.sum(params["ww"])
            + params["bw"]).astype(jnp.float32).reshape(1)       # (1,)

    # Fold 1/sqrt(d_k) into Q (fuses into the bf16 cast; C/L-times fewer multiplies than
    # scaling the score block in-kernel).
    q_bf = (Q * (1.0 / math.sqrt(C))).astype(jnp.bfloat16)       # (B, H, L, C)
    kT_bf = jnp.swapaxes(K, -1, -2).astype(jnp.bfloat16)         # (B, H, C, L)

    # Pad query-rows and key-cols to multiples of 128: lane-aligned tiles, unmasked
    # lane-dense output stores, and bounded tile sizes for any L.
    Lq = _round_up(L, 128)
    Lk = _round_up(L, 128)
    if Lq != L:
        q_bf = jnp.pad(q_bf, ((0, 0), (0, 0), (0, Lq - L), (0, 0)))
    if Lk != L:
        kT_bf = jnp.pad(kT_bf, ((0, 0), (0, 0), (0, 0), (0, Lk - L)))
        vfold = jnp.pad(vfold, ((0, 0), (0, 0), (0, Lk - L)))
    return q_bf, kT_bf, vfold, bias, Lq, Lk


def multi_head_attention_forward(enc, params, *, masked=True, tq=None, tkv=None):
    B, S, d = enc.shape
    H, _, cd = params["Wq"].shape
    C = cd // d
    L = S * d

    q_bf, kT_bf, vfold, bias, Lq, Lk = _prepare_inputs(enc, params)

    # ---- per-generation sizing ------------------------------------------------
    try:
        vmem_cap = int(pltpu.get_tpu_info().vmem_capacity_bytes)
    except Exception:
        vmem_cap = 64 * 1024 * 1024          # conservative (v7x-sized) fallback
    try:
        kind = jax.devices()[0].device_kind.lower()
    except Exception:
        kind = ""

    if tq is None:
        # v6e: 256-deep MXU + 128 MiB VMEM -> fill the M dim; v5e (128-deep MXU) and
        # v7x (64 MiB VMEM) keep 128-row Q tiles.
        tq = 256 if ("v6" in kind and vmem_cap >= 96 * 2**20 and Lq % 256 == 0) else 128
        tq = min(tq, Lq)
        # v7x has 2 TensorCores: keep the parallel grid >= 2 steps when possible.
        if B * (Lq // tq) < 2 and tq >= 256:
            tq //= 2
    assert Lq % tq == 0, (Lq, tq)

    vmem_limit = min(int(0.75 * vmem_cap), 100 * 2**20)

    if tkv is None:
        # Bound the live (H, tq, tkv) f32 score/exp temporaries to a fraction of the
        # VMEM budget (flash-style KV tiling; required for v7x's 64 MiB at large L).
        budget = vmem_limit // 6
        cap = max(128, (budget // (H * tq * 4)) // 128 * 128)
        tkv = _pick_tile(Lk, cap)
    assert Lk % tkv == 0, (Lk, tkv)

    nq, nkv = Lq // tq, Lk // tkv

    # Advisory cost estimate so XLA schedules the projection einsums vs. the kernel well.
    flops = 2 * B * H * Lq * Lk * C + 4 * B * H * Lq * Lk
    transcendentals = B * H * Lq * Lk
    bytes_accessed = int(q_bf.size * 2 + kT_bf.size * 2 + vfold.size * 4 + B * Lq * 4)
    cost = pl.CostEstimate(flops=int(flops), transcendentals=int(transcendentals),
                           bytes_accessed=bytes_accessed)

    # TODO(synk): K^T / vfold blocks only change with the batch index; pl.Buffered(1)
    # (single-buffering) would save a little VMEM at very large L.
    out = pl.pallas_call(
        functools.partial(_mha_kernel, masked=masked,
                          n_valid_keys=L, padded_keys=(Lk != L)),
        out_shape=jax.ShapeDtypeStruct((B, 1, Lq), jnp.float32),   # lane-dense output
        grid=(B, nq, nkv),
        in_specs=[
            pl.BlockSpec((1, H, tq, C), lambda b, qi, kv: (b, 0, qi, 0)),    # Q tile
            pl.BlockSpec((1, H, C, tkv), lambda b, qi, kv: (b, 0, 0, kv)),   # K^T tile
            pl.BlockSpec((1, H, tkv), lambda b, qi, kv: (b, 0, kv)),         # folded V tile
            pl.BlockSpec(memory_space=pltpu.MemorySpace.SMEM),               # scalar bias
        ],
        out_specs=pl.BlockSpec((1, 1, tq), lambda b, qi, kv: (b, 0, qi)),
        scratch_shapes=[pltpu.VMEM((H, tq), jnp.float32)] * 3,   # m, l, acc
        compiler_params=pltpu.CompilerParams(
            dimension_semantics=("parallel", "parallel", "arbitrary"),
            vmem_limit_bytes=int(vmem_limit),
        ),
        cost_estimate=cost,
    )(q_bf, kT_bf, vfold, bias)

    return out[:, :, :L].reshape(B, 1, L, 1)


def reference_forward(enc, params, *, masked=True, qk_dtype=jnp.bfloat16):
    """Plain-JAX reference mirroring the PyTorch forward (eval mode), proj_z/proj_w NOT folded.

    qk_dtype=jnp.bfloat16 matches the kernel's precision choice (bf16 Q/K for the score
    matmul, f32 accumulation); pass jnp.float32 for strict f32 torch math.
    """
    B, S, d = enc.shape
    H, _, cd = params["Wq"].shape
    C = cd // d
    L = S * d
    Q, K, V = _project_qkv(enc, params)
    Qc = Q.astype(qk_dtype).astype(jnp.float32)
    Kc = K.astype(qk_dtype).astype(jnp.float32)
    att = jnp.einsum("bhlc,bhmc->bhlm", Qc, Kc) / math.sqrt(C)
    if masked:
        keep = jnp.tril(jnp.ones((L, L), bool))
        att = jnp.where(keep[None, None], att, -1.0e9)
    att = jax.nn.softmax(att, axis=-1)
    o = jnp.einsum("bhlm,bhmc->bhlc", att, V)                              # per-head attn out
    z = jnp.einsum("bhlc,c->bhl", o, params["wz"][0]) + params["bz"]       # proj_z
    out = jnp.einsum("bhl,h->bl", z, params["ww"]) + params["bw"]          # transpose + proj_w
    return out.reshape(B, 1, L, 1)


if __name__ == "__main__":
    B, S = 2, 8
    heads, d_model, c1 = 2, 8, 4        # d_model divisible by heads; L = S * d_model = 64

    key = jax.random.PRNGKey(0)
    k_enc, k_par = jax.random.split(key)
    enc = jax.random.normal(k_enc, (B, S, d_model), jnp.float32)
    params = init_params(k_par, heads, d_model, c1)
    L = S * d_model

    for masked in (True, False):
        out = multi_head_attention_forward(enc, params, masked=masked)
        out = jax.block_until_ready(out)
        assert out.shape == (B, 1, L, 1), out.shape

        # Reference keeps the full torch op sequence (un-folded proj_z/proj_w), sharing only
        # the kernel's bf16 Q/K cast -- validates folding, masking/padding, online softmax,
        # KV tiling and head mixing.
        ref = reference_forward(enc, params, masked=masked)
        err = float(jnp.max(jnp.abs(out - ref)))
        assert jnp.allclose(out, ref, rtol=5e-3, atol=5e-3), (masked, err)

    print("KERNEL_OK")
</pallas_src>

<mosaic_0001>
module attributes {stable_mosaic.version = 11 : i64} {
  func.func @_mha_kernel(%arg0: i32, %arg1: i32, %arg2: i32, %arg3: memref<1x2x128x4xbf16, #tpu.memory_space<vmem>>, %arg4: memref<1x2x4x128xbf16, #tpu.memory_space<vmem>>, %arg5: memref<1x2x128xf32, #tpu.memory_space<vmem>>, %arg6: memref<1xf32, #tpu.memory_space<smem>>, %arg7: memref<1x1x128xf32, #tpu.memory_space<vmem>>, %arg8: memref<2x128xf32, #tpu.memory_space<vmem>>, %arg9: memref<2x128xf32, #tpu.memory_space<vmem>>, %arg10: memref<2x128xf32, #tpu.memory_space<vmem>>) attributes {dimension_semantics = [#tpu.dimension_semantics<parallel>, #tpu.dimension_semantics<parallel>, #tpu.dimension_semantics<arbitrary>], iteration_bounds = array<i64: 2, 1, 1>, scalar_prefetch = 0 : i64, scratch_operands = 3 : i64, tpu.core_type = #tpu.core_type<tc>, window_params = [{transform_indices = @transform_0, window_bounds = array<i64: 1, 2, 128, 4>}, {transform_indices = @transform_1, window_bounds = array<i64: 1, 2, 4, 128>}, {transform_indices = @transform_2, window_bounds = array<i64: 1, 2, 128>}, {transform_indices = @transform_3, window_bounds = array<i64: 1>}, {transform_indices = @transform_4, window_bounds = array<i64: 1, 1, 128>}]} {
    %c0_i32 = arith.constant 0 : i32
    %0 = arith.cmpi eq, %arg2, %c0_i32 : i32
    %1 = arith.extui %0 : i1 to i32
    %c0_i32_0 = arith.constant 0 : i32
    %2 = arith.cmpi ne, %1, %c0_i32_0 : i32
    scf.if %2 {
      %cst = arith.constant 0xFF800000 : f32
      %12 = vector.broadcast %cst : f32 to vector<2x128xf32>
      %c0 = arith.constant 0 : index
      %c0_6 = arith.constant 0 : index
      %13 = vector.load %arg8[%c0, %c0_6] : memref<2x128xf32, #tpu.memory_space<vmem>>, vector<2x128xf32>
      tpu.vector_store %arg8[%c0, %c0_6], %12 {strides = array<i32>} : memref<2x128xf32, #tpu.memory_space<vmem>>, vector<2x128xf32>,
      %cst_7 = arith.constant 0.000000e+00 : f32
      %14 = vector.broadcast %cst_7 : f32 to vector<2x128xf32>
      %c0_8 = arith.constant 0 : index
      %c0_9 = arith.constant 0 : index
      %15 = vector.load %arg9[%c0_8, %c0_9] : memref<2x128xf32, #tpu.memory_space<vmem>>, vector<2x128xf32>
      tpu.vector_store %arg9[%c0_8, %c0_9], %14 {strides = array<i32>} : memref<2x128xf32, #tpu.memory_space<vmem>>, vector<2x128xf32>,
      %cst_10 = arith.constant 0.000000e+00 : f32
      %16 = vector.broadcast %cst_10 : f32 to vector<2x128xf32>
      %c0_11 = arith.constant 0 : index
      %c0_12 = arith.constant 0 : index
      %17 = vector.load %arg10[%c0_11, %c0_12] : memref<2x128xf32, #tpu.memory_space<vmem>>, vector<2x128xf32>
      tpu.vector_store %arg10[%c0_11, %c0_12], %16 {strides = array<i32>} : memref<2x128xf32, #tpu.memory_space<vmem>>, vector<2x128xf32>,
    } else {
    }
    %c128_i32 = arith.constant 128 : i32
    %3 = arith.muli %arg1, %c128_i32 : i32
    %c128_i32_1 = arith.constant 128 : i32
    %4 = arith.muli %arg2, %c128_i32_1 : i32
    %c128_i32_2 = arith.constant 128 : i32
    %5 = arith.addi %3, %c128_i32_2 : i32
    %6 = arith.cmpi slt, %4, %5 : i32
    %7 = arith.extui %6 : i1 to i32
    %c0_i32_3 = arith.constant 0 : i32
    %8 = arith.cmpi ne, %7, %c0_i32_3 : i32
    scf.if %8 {
      %c0 = arith.constant 0 : index
      %c0_6 = arith.constant 0 : index
      %c0_7 = arith.constant 0 : index
      %c0_8 = arith.constant 0 : index
      %12 = vector.load %arg3[%c0, %c0_6, %c0_7, %c0_8] : memref<1x2x128x4xbf16, #tpu.memory_space<vmem>>, vector<1x2x128x4xbf16>
      %13 = vector.shape_cast %12 : vector<1x2x128x4xbf16> to vector<2x128x4xbf16>
      %c0_9 = arith.constant 0 : index
      %c0_10 = arith.constant 0 : index
      %c0_11 = arith.constant 0 : index
      %c0_12 = arith.constant 0 : index
      %14 = vector.load %arg4[%c0_9, %c0_10, %c0_11, %c0_12] : memref<1x2x4x128xbf16, #tpu.memory_space<vmem>>, vector<1x2x4x128xbf16>
      %15 = vector.shape_cast %14 : vector<1x2x4x128xbf16> to vector<2x4x128xbf16>
      %c0_13 = arith.constant 0 : index
      %c0_14 = arith.constant 0 : index
      %c0_15 = arith.constant 0 : index
      %16 = vector.load %arg5[%c0_13, %c0_14, %c0_15] : memref<1x2x128xf32, #tpu.memory_space<vmem>>, vector<1x2x128xf32>
      %17 = vector.shape_cast %16 : vector<1x2x128xf32> to vector<2x128xf32>
      "tpu.trace_start"() <{level = 10 : i32, message = "htc,hck->htk"}> : () -> ()
      %cst = arith.constant dense<0.000000e+00> : vector<2x128x128xf32>
      %18 = tpu.matmul %13, %15, %cst {dimension_numbers = #tpu.dot_dimension_numbers<[2], [1], [1], [2], [0, 0, 0, 1, 1, 2], [0], [0]>} : vector<2x128x4xbf16>, vector<2x4x128xbf16>, vector<2x128x128xf32> -> vector<2x128x128xf32>
      "tpu.trace_stop"() : () -> ()
      %19 = tpu.iota {dimensions = array<i32: 0>} : vector<128x128xi32>
      %20 = vector.broadcast %3 : i32 to vector<128x128xi32>
      %21 = arith.addi %20, %19 : vector<128x128xi32>
      %22 = tpu.iota {dimensions = array<i32: 1>} : vector<128x128xi32>
      %23 = vector.broadcast %4 : i32 to vector<128x128xi32>
      %24 = arith.addi %23, %22 : vector<128x128xi32>
      %25 = arith.cmpi sge, %21, %24 : vector<128x128xi32>
      %26 = vector.shape_cast %25 : vector<128x128xi1> to vector<1x128x128xi1>
      %cst_16 = arith.constant -1.000000e+09 : f32
      %27 = vector.shape_cast %26 : vector<1x128x128xi1> to vector<1x128x128xi1>
      %28 = vector.broadcast %27 : vector<1x128x128xi1> to vector<2x128x128xi1>
      %29 = vector.broadcast %cst_16 : f32 to vector<2x128x128xf32>
      %30 = arith.select %28, %18, %29 : vector<2x128x128xi1>, vector<2x128x128xf32>
      %c0_17 = arith.constant 0 : index
      %c0_18 = arith.constant 0 : index
      %31 = vector.load %arg8[%c0_17, %c0_18] : memref<2x128xf32, #tpu.memory_space<vmem>>, vector<2x128xf32>
      %cst_19 = arith.constant dense<0xFF800000> : vector<2x128xf32>
      %32 = vector.multi_reduction <maximumf>, %30, %cst_19 [2] : vector<2x128x128xf32> to vector<2x128xf32>
      %33 = arith.maximumf %31, %32 : vector<2x128xf32>
      %34 = arith.subf %31, %33 : vector<2x128xf32>
      %35 = math.exp %34 : vector<2x128xf32>
      %36 = vector.shape_cast %33 : vector<2x128xf32> to vector<2x128x1xf32>
      %37 = vector.broadcast %36 : vector<2x128x1xf32> to vector<2x128x128xf32>
      %38 = arith.subf %30, %37 : vector<2x128x128xf32>
      %39 = math.exp %38 : vector<2x128x128xf32>
      %c0_20 = arith.constant 0 : index
      %c0_21 = arith.constant 0 : index
      %40 = vector.load %arg9[%c0_20, %c0_21] : memref<2x128xf32, #tpu.memory_space<vmem>>, vector<2x128xf32>
      %41 = arith.mulf %35, %40 : vector<2x128xf32>
      %cst_22 = arith.constant dense<0.000000e+00> : vector<2x128xf32>
      %42 = vector.multi_reduction <add>, %39, %cst_22 [2] : vector<2x128x128xf32> to vector<2x128xf32>
      %43 = arith.addf %41, %42 : vector<2x128xf32>
      %c0_23 = arith.constant 0 : index
      %c0_24 = arith.constant 0 : index
      %44 = vector.load %arg9[%c0_23, %c0_24] : memref<2x128xf32, #tpu.memory_space<vmem>>, vector<2x128xf32>
      tpu.vector_store %arg9[%c0_23, %c0_24], %43 {strides = array<i32>} : memref<2x128xf32, #tpu.memory_space<vmem>>, vector<2x128xf32>,
      %c0_25 = arith.constant 0 : index
      %c0_26 = arith.constant 0 : index
      %45 = vector.load %arg10[%c0_25, %c0_26] : memref<2x128xf32, #tpu.memory_space<vmem>>, vector<2x128xf32>
      %46 = arith.mulf %35, %45 : vector<2x128xf32>
      %47 = vector.shape_cast %17 : vector<2x128xf32> to vector<2x1x128xf32>
      %48 = vector.broadcast %47 : vector<2x1x128xf32> to vector<2x128x128xf32>
      %49 = arith.mulf %39, %48 : vector<2x128x128xf32>
      %cst_27 = arith.constant dense<0.000000e+00> : vector<2x128xf32>
      %50 = vector.multi_reduction <add>, %49, %cst_27 [2] : vector<2x128x128xf32> to vector<2x128xf32>
      %51 = arith.addf %46, %50 : vector<2x128xf32>
      %c0_28 = arith.constant 0 : index
      %c0_29 = arith.constant 0 : index
      %52 = vector.load %arg10[%c0_28, %c0_29] : memref<2x128xf32, #tpu.memory_space<vmem>>, vector<2x128xf32>
      tpu.vector_store %arg10[%c0_28, %c0_29], %51 {strides = array<i32>} : memref<2x128xf32, #tpu.memory_space<vmem>>, vector<2x128xf32>,
      %c0_30 = arith.constant 0 : index
      %c0_31 = arith.constant 0 : index
      %53 = vector.load %arg8[%c0_30, %c0_31] : memref<2x128xf32, #tpu.memory_space<vmem>>, vector<2x128xf32>
      tpu.vector_store %arg8[%c0_30, %c0_31], %33 {strides = array<i32>} : memref<2x128xf32, #tpu.memory_space<vmem>>, vector<2x128xf32>,
    } else {
    }
    %c0_i32_4 = arith.constant 0 : i32
    %9 = arith.cmpi eq, %arg2, %c0_i32_4 : i32
    %10 = arith.extui %9 : i1 to i32
    %c0_i32_5 = arith.constant 0 : i32
    %11 = arith.cmpi ne, %10, %c0_i32_5 : i32
    scf.if %11 {
      %c0 = arith.constant 0 : index
      %c0_6 = arith.constant 0 : index
      %12 = vector.load %arg10[%c0, %c0_6] : memref<2x128xf32, #tpu.memory_space<vmem>>, vector<2x128xf32>
      %c0_7 = arith.constant 0 : index
      %c0_8 = arith.constant 0 : index
      %13 = vector.load %arg9[%c0_7, %c0_8] : memref<2x128xf32, #tpu.memory_space<vmem>>, vector<2x128xf32>
      %14 = tpu.reciprocal %13 {approx = true} : vector<2x128xf32> -> vector<2x128xf32>
      %15 = arith.mulf %12, %14 : vector<2x128xf32>
      %cst = arith.constant dense<0.000000e+00> : vector<128xf32>
      %16 = vector.multi_reduction <add>, %15, %cst [0] : vector<2x128xf32> to vector<128xf32>
      %17 = vector.shape_cast %16 : vector<128xf32> to vector<1x128xf32>
      %c0_9 = arith.constant 0 : index
      %18 = memref.load %arg6[%c0_9] : memref<1xf32, #tpu.memory_space<smem>>
      %19 = vector.broadcast %18 : f32 to vector<1x128xf32>
      %20 = arith.addf %17, %19 : vector<1x128xf32>
      %c0_10 = arith.constant 0 : index
      %c0_11 = arith.constant 0 : index
      %c0_12 = arith.constant 0 : index
      %21 = vector.load %arg7[%c0_10, %c0_11, %c0_12] : memref<1x1x128xf32, #tpu.memory_space<vmem>>, vector<1x1x128xf32>
      %22 = vector.shape_cast %21 : vector<1x1x128xf32> to vector<1x128xf32>
      %23 = vector.shape_cast %20 : vector<1x128xf32> to vector<1x1x128xf32>
      tpu.vector_store %arg7[%c0_10, %c0_11, %c0_12], %23 {strides = array<i32>} : memref<1x1x128xf32, #tpu.memory_space<vmem>>, vector<1x1x128xf32>,
    } else {
    }
    return
  }
  func.func @transform_0(%arg0: i32, %arg1: i32, %arg2: i32) -> (i32, i32, i32, i32) {
    %c0_i32 = arith.constant 0 : i32
    %c0_i32_0 = arith.constant 0 : i32
    %c0_i32_1 = arith.constant 0 : i32
    return %arg0, %c0_i32, %arg1, %c0_i32_0 : i32, i32, i32, i32
  }
  func.func @transform_1(%arg0: i32, %arg1: i32, %arg2: i32) -> (i32, i32, i32, i32) {
    %c0_i32 = arith.constant 0 : i32
    %c0_i32_0 = arith.constant 0 : i32
    %c0_i32_1 = arith.constant 0 : i32
    return %arg0, %c0_i32, %c0_i32_0, %arg2 : i32, i32, i32, i32
  }
  func.func @transform_2(%arg0: i32, %arg1: i32, %arg2: i32) -> (i32, i32, i32) {
    %c0_i32 = arith.constant 0 : i32
    %c0_i32_0 = arith.constant 0 : i32
    return %arg0, %c0_i32, %arg2 : i32, i32, i32
  }
  func.func @transform_3(%arg0: i32, %arg1: i32, %arg2: i32) -> i32 {
    %c0_i32 = arith.constant 0 : i32
    %c0_i32_0 = arith.constant 0 : i32
    return %c0_i32 : i32
  }
  func.func @transform_4(%arg0: i32, %arg1: i32, %arg2: i32) -> (i32, i32, i32) {
    %c0_i32 = arith.constant 0 : i32
    %c0_i32_0 = arith.constant 0 : i32
    return %arg0, %c0_i32, %arg1 : i32, i32, i32
  }
}

</mosaic_0001>

<bundles_post_ra>
// kernel: tpu_custom_call.1
= control target key start
LH: loop header
LB: loop body
LE: loop exit
PB: predicated region body
PF: predicated region fallthrough
CT: control target
= control target key end

     0   :  { %s3137_s0 = inlined_call_operand.vmem [shape: bf16[2,2,128,4], index: 0, kind: input, shape index: {}]   ;;  %s3138_s1 = inlined_call_operand.vmem [shape: bf16[2,2,4,128], index: 1, kind: input, shape index: {}]   ;;  %s3139_s2 = inlined_call_operand.vmem [shape: f32[2,2,128], index: 2, kind: input, shape index: {}]   ;;  %s3140_s3 = inlined_call_operand.<no memory space> [shape: f32[1], index: 3, kind: input, shape index: {}]   ;;  %s3141_s4 = inlined_call_operand.hbm [shape: f32[2,1,128], index: 4, kind: output, shape index: {}]  }
   0x1   :  { %9 = sst [smem:[#allocation5]] %s3140_s3 }
   0x2   :  { %10 = vsyncpa [#allocation7], 0 }
   0x3   :  { %12 = vsyncpa [#allocation7 + $0x1], 0  ;;  %s2395_s17 = smov 0   ;;  %s2397_s18 = smov 0  }
   0x4   :  { %s2399_s19 = smov 0   ;;  %s2401_s20 = smov 0  }
   0x5   :  { %s2403_s21 = smov 0   ;;  %s2405_s22 = smov 0  }
   0x6 LB: > { %s2037_s3 = sadd.s32 4294967295, %s2361_s22   ;;  %s2038_s23 = sadd.s32 4294967294, %s2361_s22   ;;  %s2361_s22 = sphi %s2405_s22, %s18_s22   ;;  %s2357_s21 = sphi %s2403_s21, %s3180_s21   ;;  %s2353_s20 = sphi %s2401_s20, %s3179_s20   ;;  %s2349_s19 = sphi %s2399_s19, %s3178_s19   ;;  %s2345_s18 = sphi %s2397_s18, %s3177_s18   ;;  %s2341_s17 = sphi %s2395_s17, %s3176_s17  }
   0x7   : > { %s37_s24 = sadd.s32 1, %s2357_s21  ;;  %s151_s25 = sadd.s32 1, %s2349_s19 }
   0x8   : > { %p39_p0 = scmp.ge.s32.totalorder %s37_s24, 2  ;;  %p161_p1 = scmp.ne.s32.totalorder %s2349_s19, %s2345_s18 }
   0x9   : > { %p162_p2 = scmp.eq.s32.totalorder %s2037_s3, 1  ;;  %p167_p3 = scmp.ne.s32.totalorder %s2345_s18, %s2341_s17 }
   0xa   : > { %s3182_s24 = smov (%p39_p0, %s37_s24), 0  ;;  %p168_p5 = scmp.eq.s32.totalorder %s2038_s23, 1 }
   0xb   : > { %p2435_p4 = por %p162_p2, %p161_p1  ;;  %s146_s27 = ssub.s32 %s2357_s21, %s3182_s24 }
   0xc   : > { %p2041_p6 = scmp.ge.s32.totalorder %s2361_s22, 1  ;;  %p149_p7 = scmp.eq.s32.totalorder %s146_s27, 0 }
   0xd   : > { %p2442_p8 = por %p168_p5, %p167_p3  ;;  %p223_p9 = scmp.lt.s32.totalorder %s2361_s22, 3 }
   0xe   : > { %s2448_s29 = scalar_select %p149_p7, %s2349_s19, %s151_s25  }
   0xf   : > { %p224_p10 = pnand %p2041_p6, %p223_p9 }
  0x11   : > { %227 = sbr.rel (%p224_p10) target bundleno = 906 (0x38a), region = 36 }
  0x18   : > { %p268_p11 = scmp.lt.s32.totalorder %s2353_s20, 1  ;;  %vm3154_vm0 = vcmask 1041408   ;;  %vm382_vm1 = vcmask 31744   ;;  %v672_v20 = vlaneseq  ;;  %s1913_s3 = sld [smem:[#allocation5]] }
  0x19   : > { %s265_s23 = sand.u32 1, %s2345_s18   ;;  %s2080_s25 = sshll.u32 %s2353_s20, 4 }
  0x1a   : > { %s2452_s30 = scalar_select %p268_p11, %s2353_s20, 1  ;;  %v2500_v21 = vshrl.u32 %v672_v20, 7  ;;  %v2503_v23 = vand.u32 127, %v672_v20 }
  0x1b   : > { %s266_s27 = scalar_lea.vmem [#allocation6], %s265_s23  ;;  %s3090_s7 = scalar_lea.hbm %s3141_s4, %s2080_s25 }
  0x1c   : > { %s2083_s5 = sshll.u32 %s2452_s30, 7  ;;  %s2084_s6 = sshll.u32 %s2452_s30, 2  ;;  %v675_v22 = vadd.s32 16, %v2500_v21  ;;  %vm710_vm3 = vcmp.ge.s32.totalorder %v2500_v21, %v2503_v23  ;;  %v676_v31 = vadd.s32 24, %v2500_v21  ;;  %v674_v37 = vadd.s32 8, %v2500_v21 }
  0x1d   : > { %s2459_s9 = scalar_lea.vmem %s3137_s0, %s2083_s5  ;;  %s284_s12 = scalar_lea.vmem %s3138_s1, %s2084_s6  ;;  %v679_v39 = vadd.s32 48, %v2500_v21  ;;  %v677_v51 = vadd.s32 32, %v2500_v21  ;;  %v680_v57 = vadd.s32 56, %v2500_v21 }
  0x1e   : > { %v339_v0 = vld [vmem:[%s284_s12] sm:$0x3]  ;;  %v340_v1 = vld [vmem:[%s284_s12 + $0x2] sm:$0x3]  ;;  %v2201_v6 = vld [vmem:[%s2459_s9 + $0x8] sm:$0xff]   ;;  %vm712_vm2 = vcmp.ge.s32.totalorder %v675_v22, %v2503_v23  ;;  %vm713_vm4 = vcmp.ge.s32.totalorder %v676_v31, %v2503_v23  ;;  %vm711_vm5 = vcmp.ge.s32.totalorder %v674_v37, %v2503_v23  ;;  %v682_v22 = vadd.s32 72, %v2500_v21 }
  0x1f   : > { %v2199_v2 = vld [vmem:[%s2459_s9] sm:$0xff]   ;;  %2139 = vmatprep.subr.msk.bf16.mxu0 %vm3154_vm0, %v339_v0  ;;  %2140 = vmatprep.subr.msk.bf16.mxu1 %vm3154_vm0, %v340_v1  ;;  %v409_v3 = vsel %vm3154_vm0, %v339_v0, 0  ;;  %v573_v4 = vsel %vm3154_vm0, %v340_v1, 0  ;;  %v2202_v7 = vld [vmem:[%s2459_s9 + $0x48] sm:$0xff]   ;;  %v2203_v8 = vld [vmem:[%s2459_s9 + $0x10] sm:$0xff]   ;;  %vm716_vm6 = vcmp.ge.s32.totalorder %v679_v39, %v2503_v23  ;;  %vm714_vm7 = vcmp.ge.s32.totalorder %v677_v51, %v2503_v23  ;;  %s2046_s13 = sshll.u32 %s2452_s30, 1 }
  0x20   : > { %2104 = vmatpush3.bf16.msra.mxu0 %v409_v3  ;;  %2122 = vmatpush3.bf16.msra.mxu1 %v573_v4  ;;  %v2200_v5 = vld [vmem:[%s2459_s9 + $0x40] sm:$0xff]   ;;  %v2204_v9 = vld [vmem:[%s2459_s9 + $0x50] sm:$0xff]   ;;  %v2205_v10 = vld [vmem:[%s2459_s9 + $0x18] sm:$0xff]   ;;  %vm717_vm8 = vcmp.ge.s32.totalorder %v680_v57, %v2503_v23  ;;  %v678_v1 = vadd.s32 40, %v2500_v21  ;;  %vm719_vm13 = vcmp.ge.s32.totalorder %v682_v22, %v2503_v23  ;;  %v685_v31 = vadd.s32 96, %v2500_v21  ;;  %s291_s16 = scalar_lea.vmem %s3139_s2, %s2046_s13  ;;  %s1931_s30 = sshll.u32 %s266_s27, 4  ;;  %s3092_s30 = int_to_ptr.vmem [resolvable:$true] %s1931_s30 }
  0x21   : > { %2105 = vmatprep.mubr.msk.bf16.mxu0 %vm382_vm1, %v2199_v2  ;;  %2123 = vmatprep.mubr.msk.bf16.mxu1 %vm382_vm1, %v2200_v5  ;;  %v2206_v11 = vld [vmem:[%s2459_s9 + $0x58] sm:$0xff]   ;;  %v2207_v12 = vld [vmem:[%s2459_s9 + $0x20] sm:$0xff]   ;;  %v2209_v14 = vld [vmem:[%s2459_s9 + $0x28] sm:$0xff]   ;;  %v683_v2 = vadd.s32 80, %v2500_v21  ;;  %v686_v39 = vadd.s32 104, %v2500_v21  ;;  %v905_v22 = vadd.s32 4294967272, %v2503_v23 }
  0x22   : > { %v2208_v13 = vld [vmem:[%s2459_s9 + $0x60] sm:$0xff]   ;;  %v2210_v15 = vld [vmem:[%s2459_s9 + $0x68] sm:$0xff]   ;;  %v2211_v16 = vld [vmem:[%s2459_s9 + $0x30] sm:$0xff]   ;;  %vm715_vm9 = vcmp.ge.s32.totalorder %v678_v1, %v2503_v23  ;;  %vm722_vm15 = vcmp.ge.s32.totalorder %v685_v31, %v2503_v23  ;;  %v919_v31 = vadd.s32 4294967256, %v2503_v23  ;;  %vm1075_vm0 = vcmask 1041409   ;;  %s1918_s8 = scalar_lea.sflag [#allocation7], %s265_s23 }
  0x23   : > { %2106 = vmatmul.mubr.msk.bf16.vlgmr.msra.gmra.mrb[0].mxu0 %vm382_vm1, %v2201_v6  ;;  %2124 = vmatmul.mubr.msk.bf16.vlgmr.msra.gmra.mrb[0].mxu1 %vm382_vm1, %v2202_v7  ;;  %v2212_v17 = vld [vmem:[%s2459_s9 + $0x70] sm:$0xff]   ;;  %v2213_v18 = vld [vmem:[%s2459_s9 + $0x38] sm:$0xff]   ;;  %vm720_vm10 = vcmp.ge.s32.totalorder %v683_v2, %v2503_v23  ;;  %s2366_s20 = smov [#allocation6]  }
  0x24   : > { %2109 = vmatprep.mubr.msk.bf16.mxu0 %vm382_vm1, %v2203_v8  ;;  %2127 = vmatprep.mubr.msk.bf16.mxu1 %vm382_vm1, %v2204_v9  ;;  %v2214_v19 = vld [vmem:[%s2459_s9 + $0x78] sm:$0xff]   ;;  %s2283_s9 = scalar_lea.vmem %s3092_s30, 16  ;;  %s2287_s10 = sshll.u32 %s2366_s20, 4  ;;  %s2288_s10 = int_to_ptr.vmem [resolvable:$false] %s2287_s10 }
  0x25   : > { %p2284_p12 = scmp.ne.s32.totalorder %s3092_s30, %s2283_s9  ;;  %s2289_s11 = scalar_lea.vmem %s2288_s10, 32 }
  0x26   : > { %p2290_p1 = scmp.lt.s32.totalorder %s3092_s30, %s2288_s10  ;;  %p2291_p2 = scmp.lt.s32.totalorder %s2289_s11, %s2283_s9 }
  0x27   : > { %p2285_p13 = pnand %p2284_p12, %p2435_p4 }
  0x28   : > { %p2292_p3 = por %p2291_p2, %p2290_p1 }
  0x29   : > { %p2286_p0 = pneg %p2285_p13 }
  0x2b   : > { %2110 = vmatmul.mubr.msk.bf16.gmra.mrb[4].mxu0 %vm382_vm1, %v2205_v10  ;;  %2128 = vmatmul.mubr.msk.bf16.gmra.mrb[4].mxu1 %vm382_vm1, %v2206_v11  ;;  %p2293_p5 = pnand %p2292_p3, %p2286_p0 }
  0x2c   : > { %2113 = vmatprep.mubr.msk.bf16.mxu0 %vm382_vm1, %v2207_v12  ;;  %2131 = vmatprep.mubr.msk.bf16.mxu1 %vm382_vm1, %v2208_v13 }
  0x33   : > { %2114 = vmatmul.mubr.msk.bf16.gmra.mrb[8].mxu0 %vm382_vm1, %v2209_v14  ;;  %2132 = vmatmul.mubr.msk.bf16.gmra.mrb[8].mxu1 %vm382_vm1, %v2210_v15  ;;  %v681_v15 = vadd.s32 64, %v2500_v21 }
  0x34   : > { %2117 = vmatprep.mubr.msk.bf16.mxu0 %vm382_vm1, %v2211_v16  ;;  %2135 = vmatprep.mubr.msk.bf16.mxu1 %vm382_vm1, %v2212_v17 }
  0x35   : > { %vm718_vm11 = vcmp.ge.s32.totalorder %v681_v15, %v2503_v23 }
  0x3b   : > { %2118 = vmatmul.mubr.msk.bf16.gmra.mrb[12].mxu0 %vm382_vm1, %v2213_v18  ;;  %2136 = vmatmul.mubr.msk.bf16.gmra.mrb[12].mxu1 %vm382_vm1, %v2214_v19  ;;  %v684_v18 = vadd.s32 88, %v2500_v21 }
  0x3d   : > { %vm721_vm12 = vcmp.ge.s32.totalorder %v684_v18, %v2503_v23  ;;  %v912_v18 = vadd.s32 4294967264, %v2503_v23 }
  0xf6   : > { %v2107_v24 = vpop.f32.mrb[0].mxu0  ;;  %v2125_v25 = vpop.f32.mrb[0].mxu1 }
  0xf7   : > { %v445_v26 = vpop.f32.mrb[1].mxu0  ;;  %v2506_v27 = vsel %vm712_vm2, %v2107_v24, -1e+09  ;;  %v609_v28 = vpop.f32.mrb[1].mxu1  ;;  %v2508_v29 = vsel %vm712_vm2, %v2125_v25, -1e+09  ;;  %vm723_vm2 = vcmp.ge.s32.totalorder %v686_v39, %v2503_v23 }
  0xf8   : > { %795 = vmax.xlane.f32.xlu0 %v2506_v27  ;;  %v2108_v30 = vpop.f32.mrb[2].mxu0  ;;  %827 = vmax.xlane.f32.xlu1 %v2508_v29  ;;  %v2126_v32 = vpop.f32.mrb[2].mxu1  ;;  %v2515_v35 = vsel %vm710_vm3, %v445_v26, -1e+09  ;;  %v2517_v36 = vsel %vm710_vm3, %v609_v28, -1e+09 }
  0xf9   : > { %v448_v33 = vpop.f32.mrb[3].mxu0  ;;  %v612_v34 = vpop.f32.mrb[3].mxu1  ;;  %v2524_v40 = vsel %vm713_vm4, %v2108_v30, -1e+09  ;;  %v2526_v43 = vsel %vm713_vm4, %v2126_v32, -1e+09 }
  0xfa   : > { %v2532_v49 = vsel %vm711_vm5, %v448_v33, -1e+09  ;;  %v2534_v50 = vsel %vm711_vm5, %v612_v34, -1e+09  ;;  %v687_v24 = vadd.s32 112, %v2500_v21  ;;  %v688_v34 = vadd.s32 120, %v2500_v21 }
  0xfb   : > { %vm896_vm3 = vcmask 130112   ;;  %vm903_vm4 = vcmask 195712   ;;  %vm910_vm5 = vcmask 261312  }
  0xfc   : > { %791 = vmax.xlane.f32.xlu0 %v2515_v35  ;;  %823 = vmax.xlane.f32.xlu1 %v2517_v36  ;;  %vm724_vm14 = vcmp.ge.s32.totalorder %v687_v24, %v2503_v23  ;;  %vm725_vm1 = vcmp.ge.s32.totalorder %v688_v34, %v2503_v23 }
  0xfe   : > { %v2111_v38 = vpop.f32.mrb[4].mxu0  ;;  %v2129_v41 = vpop.f32.mrb[4].mxu1 }
  0xff   : > { %v461_v42 = vpop.f32.mrb[5].mxu0  ;;  %v625_v44 = vpop.f32.mrb[5].mxu1  ;;  %v2539_v52 = vsel %vm716_vm6, %v2111_v38, -1e+09  ;;  %v2541_v53 = vsel %vm716_vm6, %v2129_v41, -1e+09 }
 0x100   : > { %797 = vmax.xlane.f32.xlu0 %v2524_v40  ;;  %v2112_v45 = vpop.f32.mrb[6].mxu0  ;;  %829 = vmax.xlane.f32.xlu1 %v2526_v43  ;;  %v2130_v46 = vpop.f32.mrb[6].mxu1  ;;  %v2547_v63 = vsel %vm714_vm7, %v461_v42, -1e+09  ;;  %v2549_v0 = vsel %vm714_vm7, %v625_v44, -1e+09 }
 0x101   : > { %v464_v47 = vpop.f32.mrb[7].mxu0  ;;  %v628_v48 = vpop.f32.mrb[7].mxu1  ;;  %v2556_v4 = vsel %vm717_vm8, %v2112_v45, -1e+09  ;;  %v2558_v7 = vsel %vm717_vm8, %v2130_v46, -1e+09 }
 0x102   : > { %v2564_v13 = vsel %vm715_vm9, %v464_v47, -1e+09  ;;  %v2566_v14 = vsel %vm715_vm9, %v628_v48, -1e+09  ;;  %v2363_v46 = vmov -inf   ;;  %v2364_v47 = vmov 0.0  }
 0x103   : > { %297 = vst [vmem:[#allocation2] sm:$0x3] %v2363_v46  ;;  %298 = vst [vmem:[#allocation3] sm:$0x3] %v2364_v47  ;;  %vm917_vm6 = vcmask 326912   ;;  %vm924_vm7 = vcmask 392512  }
 0x104   : > { %793 = vmax.xlane.f32.xlu0 %v2532_v49  ;;  %825 = vmax.xlane.f32.xlu1 %v2534_v50  ;;  %299 = vst [vmem:[#allocation4] sm:$0x3] %v2364_v47  ;;  %vm931_vm8 = vcmask 458112   ;;  %vm938_vm9 = vcmask 523712  }
 0x106   : > { %v2115_v54 = vpop.f32.mrb[8].mxu0  ;;  %v2133_v55 = vpop.f32.mrb[8].mxu1 }
 0x107   : > { %v477_v56 = vpop.f32.mrb[9].mxu0  ;;  %v641_v58 = vpop.f32.mrb[9].mxu1  ;;  %v2571_v16 = vsel %vm720_vm10, %v2115_v54, -1e+09  ;;  %v2573_v17 = vsel %vm720_vm10, %v2133_v55, -1e+09 }
 0x108   : > { %803 = vmax.xlane.f32.xlu0 %v2539_v52  ;;  %v2116_v59 = vpop.f32.mrb[10].mxu0  ;;  %835 = vmax.xlane.f32.xlu1 %v2541_v53  ;;  %v2134_v60 = vpop.f32.mrb[10].mxu1  ;;  %v2579_v19 = vsel %vm718_vm11, %v477_v56, -1e+09  ;;  %v2581_v20 = vsel %vm718_vm11, %v641_v58, -1e+09 }
 0x109   : > { %v480_v61 = vpop.f32.mrb[11].mxu0  ;;  %v644_v62 = vpop.f32.mrb[11].mxu1  ;;  %v2588_v25 = vsel %vm721_vm12, %v2116_v59, -1e+09  ;;  %v2590_v26 = vsel %vm721_vm12, %v2134_v60, -1e+09 }
 0x10a   : > { %v2596_v28 = vsel %vm719_vm13, %v480_v61, -1e+09  ;;  %v2598_v30 = vsel %vm719_vm13, %v644_v62, -1e+09  ;;  %vm945_vm10 = vcmask 589312   ;;  %vm952_vm11 = vcmask 654912  }
 0x10b   : > { %vm959_vm12 = vcmask 720512   ;;  %vm966_vm13 = vcmask 786112  }
 0x10c   : > { %799 = vmax.xlane.f32.xlu0 %v2547_v63  ;;  %831 = vmax.xlane.f32.xlu1 %v2549_v0 }
 0x10e   : > { %v2119_v3 = vpop.f32.mrb[12].mxu0  ;;  %v2137_v5 = vpop.f32.mrb[12].mxu1 }
 0x10f   : > { %v493_v6 = vpop.f32.mrb[13].mxu0  ;;  %v657_v8 = vpop.f32.mrb[13].mxu1  ;;  %v2603_v32 = vsel %vm724_vm14, %v2119_v3, -1e+09  ;;  %v2605_v33 = vsel %vm724_vm14, %v2137_v5, -1e+09 }
 0x110   : > { %805 = vmax.xlane.f32.xlu0 %v2556_v4  ;;  %v2120_v9 = vpop.f32.mrb[14].mxu0  ;;  %837 = vmax.xlane.f32.xlu1 %v2558_v7  ;;  %v2138_v10 = vpop.f32.mrb[14].mxu1  ;;  %3157 = vst [vmem:[#allocation9_spill] sm:$0xff] %v2603_v32  ;;  %3158 = vst [vmem:[#allocation10_spill] sm:$0xff] %v2605_v33  ;;  %v2611_v37 = vsel %vm722_vm15, %v493_v6, -1e+09 }
 0x111   : > { %v496_v11 = vpop.f32.mrb[15].mxu0  ;;  %v660_v12 = vpop.f32.mrb[15].mxu1  ;;  %v2613_v38 = vsel %vm722_vm15, %v657_v8, -1e+09  ;;  %v2619_v41 = vsel %vm725_vm1, %v2120_v9, -1e+09 }
 0x112   : > { %3159 = vst [vmem:[#allocation11_spill] sm:$0xff] %v2613_v38  ;;  %3160 = vst [vmem:[#allocation12_spill] sm:$0xff] %v2619_v41  ;;  %v2621_v42 = vsel %vm725_vm1, %v2138_v10, -1e+09  ;;  %v2626_v44 = vsel %vm723_vm2, %v496_v11, -1e+09 }
 0x113   : > { %3161 = vst [vmem:[#allocation13_spill] sm:$0xff] %v2621_v42  ;;  %v2628_v45 = vsel %vm723_vm2, %v660_v12, -1e+09  ;;  %v891_v5 = vadd.s32 4294967288, %v2503_v23  ;;  %v898_v10 = vadd.s32 4294967280, %v2503_v23  ;;  %v2649_v12 = vsub.s32 %v2503_v23, %v2500_v21 }
 0x114   : > { %801 = vmax.xlane.f32.xlu0 %v2564_v13  ;;  %833 = vmax.xlane.f32.xlu1 %v2566_v14  ;;  %3162 = vst [vmem:[#allocation14_spill] sm:$0xff] %v2628_v45  ;;  %vm973_vm14 = vcmask 851712   ;;  %vm980_vm15 = vcmask 917312   ;;  %vm987_vm1 = vcmask 982912   ;;  %vm994_vm2 = vcmask 1048512  }
 0x115   : > { %v2642_v9 = vsub.s32 %v891_v5, %v2500_v21  ;;  %3164 = vst [vmem:[#allocation16_spill] sm:$0xff] %v2649_v12  ;;  %v2658_v34 = vsub.s32 %v898_v10, %v2500_v21 }
 0x117   : > { %3163 = vst [vmem:[#allocation15_spill] sm:$0xff] %v2642_v9  ;;  %3165 = vst [vmem:[#allocation17_spill] sm:$0xff] %v2658_v34 }
 0x118   : > { %811 = vmax.xlane.f32.xlu0 %v2571_v16  ;;  %843 = vmax.xlane.f32.xlu1 %v2573_v17 }
 0x11c   : > { %807 = vmax.xlane.f32.xlu0 %v2579_v19  ;;  %839 = vmax.xlane.f32.xlu1 %v2581_v20 }
 0x120   : > { %813 = vmax.xlane.f32.xlu0 %v2588_v25  ;;  %845 = vmax.xlane.f32.xlu1 %v2590_v26 }
 0x124   : > { %809 = vmax.xlane.f32.xlu0 %v2596_v28  ;;  %841 = vmax.xlane.f32.xlu1 %v2598_v30 }
 0x128   : > { %819 = vmax.xlane.f32.xlu0 %v2603_v32  ;;  %851 = vmax.xlane.f32.xlu1 %v2605_v33  ;;  %v2668_v33 = vsub.s32 %v912_v18, %v2500_v21  ;;  %v933_v18 = vadd.s32 4294967240, %v2503_v23 }
 0x12c   : > { %815 = vmax.xlane.f32.xlu0 %v2611_v37  ;;  %847 = vmax.xlane.f32.xlu1 %v2613_v38 }
 0x130   : > { %821 = vmax.xlane.f32.xlu0 %v2619_v41  ;;  %853 = vmax.xlane.f32.xlu1 %v2621_v42  ;;  %v2675_v41 = vsub.s32 %v919_v31, %v2500_v21 }
 0x134   : > { %817 = vmax.xlane.f32.xlu0 %v2626_v44  ;;  %849 = vmax.xlane.f32.xlu1 %v2628_v45 }
 0x185   : > { %v796_v48 = vpop.xlane.xlu0 %795  ;;  %v828_v51 = vpop.xlane.xlu1 %827 }
 0x189   : > { %v792_v54 = vpop.xlane.xlu0 %791  ;;  %v824_v55 = vpop.xlane.xlu1 %823 }
 0x18a   : > { %v890_v47 = vrot.slane %v792_v54, %v2649_v12  ;;  %v999_v42 = vrot.slane %v824_v55, %v2649_v12  ;;  %v1008_v55 = vrot.slane %v828_v51, %v2658_v34 }
 0x18d   : > { %v798_v56 = vpop.xlane.xlu0 %797  ;;  %v830_v57 = vpop.xlane.xlu1 %829 }
 0x191   : > { %v794_v58 = vpop.xlane.xlu0 %793  ;;  %v826_v59 = vpop.xlane.xlu1 %825 }
 0x192   : > { %v895_v24 = vrot.slane %v794_v58, %v2642_v9  ;;  %v1003_v39 = vrot.slane %v826_v59, %v2642_v9  ;;  %v2671_v58 = vsub.s32 %v905_v22, %v2500_v21  ;;  %v902_v59 = vrot.slane %v796_v48, %v2658_v34 }
 0x193   : > { %v926_v9 = vadd.s32 4294967248, %v2503_v23  ;;  %v940_v48 = vadd.s32 4294967232, %v2503_v23 }
 0x194   : > { %v897_v10 = vsel %vm896_vm3, %v895_v24, %v890_v47  ;;  %v1004_v54 = vsel %vm896_vm3, %v1003_v39, %v999_v42  ;;  %v947_v42 = vadd.s32 4294967224, %v2503_v23  ;;  %v909_v39 = vrot.slane %v798_v56, %v2671_v58 }
 0x195   : > { %v2632_v60 = vpop.xlane.xlu0 %803  ;;  %v2634_v61 = vpop.xlane.xlu1 %835  ;;  %v904_v24 = vsel %vm903_vm4, %v902_v59, %v897_v10  ;;  %v1009_v47 = vsel %vm903_vm4, %v1008_v55, %v1004_v54  ;;  %v1013_v12 = vrot.slane %v830_v57, %v2671_v58  ;;  %v2696_v32 = vsub.s32 %v926_v9, %v2500_v21 }
 0x196   : > { %v911_v59 = vsel %vm910_vm5, %v909_v39, %v904_v24  ;;  %v954_v24 = vadd.s32 4294967216, %v2503_v23  ;;  %v968_v39 = vadd.s32 4294967200, %v2503_v23 }
 0x197   : > { %v1014_v56 = vsel %vm910_vm5, %v1013_v12, %v1009_v47  ;;  %v930_v55 = vrot.slane %v2632_v60, %v2696_v32  ;;  %v961_v60 = vadd.s32 4294967208, %v2503_v23 }
 0x199   : > { %v800_v62 = vpop.xlane.xlu0 %799  ;;  %v832_v1 = vpop.xlane.xlu1 %831 }
 0x19a   : > { %v916_v31 = vrot.slane %v800_v62, %v2668_v33  ;;  %v1018_v51 = vrot.slane %v832_v1, %v2668_v33  ;;  %v2703_v1 = vsub.s32 %v933_v18, %v2500_v21 }
 0x19c   : > { %v918_v54 = vsel %vm917_vm6, %v916_v31, %v911_v59  ;;  %v1019_v57 = vsel %vm917_vm6, %v1018_v51, %v1014_v56  ;;  %v1028_v31 = vrot.slane %v2634_v61, %v2696_v32  ;;  %v2737_v56 = vsub.s32 %v954_v24, %v2500_v21 }
 0x19d   : > { %v2636_v2 = vpop.xlane.xlu0 %805  ;;  %v2638_v3 = vpop.xlane.xlu1 %837 }
 0x19e   : > { %v937_v47 = vrot.slane %v2636_v2, %v2703_v1  ;;  %v1033_v59 = vrot.slane %v2638_v3, %v2703_v1  ;;  %v982_v2 = vadd.s32 4294967184, %v2503_v23  ;;  %v2746_v3 = vsub.s32 %v961_v60, %v2500_v21 }
 0x1a0   : > { %v2760_v60 = vsub.s32 %v982_v2, %v2500_v21 }
 0x1a1   : > { %v802_v6 = vpop.xlane.xlu0 %801  ;;  %v834_v8 = vpop.xlane.xlu1 %833 }
 0x1a2   : > { %v923_v34 = vrot.slane %v802_v6, %v2675_v41  ;;  %v1023_v62 = vrot.slane %v834_v8, %v2675_v41  ;;  %v2706_v6 = vsub.s32 %v940_v48, %v2500_v21  ;;  %v2711_v8 = vsub.s32 %v947_v42, %v2500_v21 }
 0x1a4   : > { %v925_v9 = vsel %vm924_vm7, %v923_v34, %v918_v54  ;;  %v1024_v12 = vsel %vm924_vm7, %v1023_v62, %v1019_v57 }
 0x1a5   : > { %v2645_v11 = vpop.xlane.xlu0 %811  ;;  %v2651_v15 = vpop.xlane.xlu1 %843  ;;  %v932_v34 = vsel %vm931_vm8, %v930_v55, %v925_v9  ;;  %v1029_v51 = vsel %vm931_vm8, %v1028_v31, %v1024_v12  ;;  %v975_v55 = vadd.s32 4294967192, %v2503_v23  ;;  %v2749_v12 = vsub.s32 %v968_v39, %v2500_v21 }
 0x1a6   : > { %v939_v57 = vsel %vm938_vm9, %v937_v47, %v932_v34  ;;  %v989_v31 = vadd.s32 4294967176, %v2503_v23  ;;  %v958_v34 = vrot.slane %v2645_v11, %v2737_v56 }
 0x1a9   : > { %v2661_v46 = vpop.xlane.xlu0 %807  ;;  %v2664_v5 = vpop.xlane.xlu1 %839 }
 0x1aa   : > { %v944_v42 = vrot.slane %v2661_v46, %v2706_v6  ;;  %v1038_v61 = vrot.slane %v2664_v5, %v2706_v6  ;;  %v1034_v5 = vsel %vm938_vm9, %v1033_v59, %v1029_v51 }
 0x1ad   : > { %v2680_v45 = vpop.xlane.xlu0 %813  ;;  %v2684_v22 = vpop.xlane.xlu1 %845 }
 0x1ae   : > { %v965_v11 = vrot.slane %v2680_v45, %v2746_v3 }
 0x1b1   : > { %v810_v10 = vpop.xlane.xlu0 %809  ;;  %v842_v38 = vpop.xlane.xlu1 %841 }
 0x1b2   : > { %v951_v62 = vrot.slane %v810_v10, %v2711_v8  ;;  %v1043_v46 = vrot.slane %v842_v38, %v2711_v8  ;;  %v946_v10 = vsel %vm945_vm10, %v944_v42, %v939_v57  ;;  %v1039_v38 = vsel %vm945_vm10, %v1038_v61, %v1034_v5 }
 0x1b3   : > { %v1048_v42 = vrot.slane %v2651_v15, %v2737_v56  ;;  %v2763_v61 = vsub.s32 %v975_v55, %v2500_v21  ;;  %v1053_v57 = vrot.slane %v2684_v22, %v2746_v3 }
 0x1b4   : > { %v953_v24 = vsel %vm952_vm11, %v951_v62, %v946_v10  ;;  %v1044_v47 = vsel %vm952_vm11, %v1043_v46, %v1039_v38  ;;  %v2772_v46 = vsub.s32 %v989_v31, %v2500_v21 }
 0x1b5   : > { %v2717_v18 = vpop.xlane.xlu0 %819  ;;  %v2721_v48 = vpop.xlane.xlu1 %851  ;;  %v960_v62 = vsel %vm959_vm12, %v958_v34, %v953_v24  ;;  %v1049_v59 = vsel %vm959_vm12, %v1048_v42, %v1044_v47 }
 0x1b6   : > { %v967_v55 = vsel %vm966_vm13, %v965_v11, %v960_v62  ;;  %v986_v45 = vrot.slane %v2717_v18, %v2760_v60  ;;  %v1068_v22 = vrot.slane %v2721_v48, %v2760_v60  ;;  %v2796_v48 = vsub.s32 0, %v2500_v21 }
 0x1b9   : > { %v816_v54 = vpop.xlane.xlu0 %815  ;;  %v848_v9 = vpop.xlane.xlu1 %847 }
 0x1ba   : > { %v972_v23 = vrot.slane %v816_v54, %v2749_v12  ;;  %v1058_v15 = vrot.slane %v848_v9, %v2749_v12  ;;  %v1054_v9 = vsel %vm966_vm13, %v1053_v57, %v1049_v59 }
 0x1bc   : > { %v974_v10 = vsel %vm973_vm14, %v972_v23, %v967_v55  ;;  %v1059_v24 = vsel %vm973_vm14, %v1058_v15, %v1054_v9  ;;  %v2792_v23 = vld [vmem:[#allocation2] sm:$0x3]  ;;  %v1151_v15 = vsub.s32 1, %v2500_v21 }
 0x1bd   : > { %v822_v51 = vpop.xlane.xlu0 %821  ;;  %v854_v39 = vpop.xlane.xlu1 %853 }
 0x1be   : > { %v993_v31 = vrot.slane %v822_v51, %v2772_v46  ;;  %v1073_v47 = vrot.slane %v854_v39, %v2772_v46 }
 0x1c1   : > { %v818_v2 = vpop.xlane.xlu0 %817  ;;  %v850_v54 = vpop.xlane.xlu1 %849 }
 0x1c2   : > { %v979_v5 = vrot.slane %v818_v2, %v2763_v61  ;;  %v1063_v38 = vrot.slane %v850_v54, %v2763_v61  ;;  %v2365_v54 = vmov 1966171168  }
 0x1c4   : > { %v981_v34 = vsel %vm980_vm15, %v979_v5, %v974_v10  ;;  %v1064_v42 = vsel %vm980_vm15, %v1063_v38, %v1059_v24  ;;  %v1584_v5 = vunpack.c.l.s4 %v2365_v54 }
 0x1c5   : > { %v988_v18 = vsel %vm987_vm1, %v986_v45, %v981_v34  ;;  %v1069_v62 = vsel %vm987_vm1, %v1068_v22, %v1064_v42 }
 0x1c6   : > { %v995_v11 = vsel %vm994_vm2, %v993_v31, %v988_v18  ;;  %v1074_v51 = vsel %vm994_vm2, %v1073_v47, %v1069_v62  ;;  %v1585_v45 = vunpack.c.0.s8 %v1584_v5  ;;  %v2079_v18 = vld.sshfl [vmem:[%s291_s16] sm:$0x11 pattern:$0x75316420] }
 0x1c7   : > { %v1076_v59 = vsel %vm1075_vm0, %v1074_v51, %v995_v11 }
 0x1c8   : > { %v2801_v39 = vmax.f32 %v2792_v23, %v1076_v59  ;;  %v1588_v34 = vsub.s32 %v1585_v45, %v2500_v21 }
 0x1ca   : > { %v1079_v57 = vsub.f32 %v2792_v23, %v2801_v39  ;;  %v1085_v2 = vrot.slane %v2801_v39, %v2796_v48  ;;  %1897 = vst [vmem:[#allocation2] sm:$0x3] %v2801_v39  ;;  %v1152_v55 = vrot.slane %v2801_v39, %v1151_v15  ;;  %v1589_v59 = vrot.slane %v2079_v18, %v1588_v34 }
 0x1cc   : > { %1091 = vbcast.lane.b32.xlu1 %v1085_v2, 264  ;;  %1087 = vbcast.lane.b32.xlu0 %v1085_v2, 256 }
 0x1d0   : > { %1154 = vbcast.lane.b32.xlu1 %v1152_v55, 256  ;;  %1095 = vbcast.lane.b32.xlu0 %v1085_v2, 272 }
 0x1d4   : > { %1158 = vbcast.lane.b32.xlu1 %v1152_v55, 264  ;;  %1099 = vbcast.lane.b32.xlu0 %v1085_v2, 280 }
 0x1d8   : > { %1162 = vbcast.lane.b32.xlu1 %v1152_v55, 272  ;;  %1103 = vbcast.lane.b32.xlu0 %v1085_v2, 288 }
 0x1dc   : > { %1166 = vbcast.lane.b32.xlu1 %v1152_v55, 280  ;;  %1107 = vbcast.lane.b32.xlu0 %v1085_v2, 296 }
 0x1e0   : > { %1170 = vbcast.lane.b32.xlu1 %v1152_v55, 288  ;;  %1111 = vbcast.lane.b32.xlu0 %v1085_v2, 304 }
 0x1e4   : > { %1174 = vbcast.lane.b32.xlu1 %v1152_v55, 296  ;;  %1115 = vbcast.lane.b32.xlu0 %v1085_v2, 312 }
 0x1e8   : > { %1178 = vbcast.lane.b32.xlu1 %v1152_v55, 304  ;;  %1119 = vbcast.lane.b32.xlu0 %v1085_v2, 320 }
 0x1ec   : > { %1182 = vbcast.lane.b32.xlu1 %v1152_v55, 312  ;;  %1123 = vbcast.lane.b32.xlu0 %v1085_v2, 328 }
 0x1f0   : > { %1186 = vbcast.lane.b32.xlu1 %v1152_v55, 320  ;;  %1127 = vbcast.lane.b32.xlu0 %v1085_v2, 336 }
 0x1f4   : > { %1190 = vbcast.lane.b32.xlu1 %v1152_v55, 328  ;;  %1131 = vbcast.lane.b32.xlu0 %v1085_v2, 344 }
 0x1f8   : > { %1194 = vbcast.lane.b32.xlu1 %v1152_v55, 336  ;;  %1135 = vbcast.lane.b32.xlu0 %v1085_v2, 352 }
 0x1fc   : > { %1198 = vbcast.lane.b32.xlu1 %v1152_v55, 344  ;;  %1139 = vbcast.lane.b32.xlu0 %v1085_v2, 360 }
 0x200   : > { %1202 = vbcast.lane.b32.xlu1 %v1152_v55, 352  ;;  %1143 = vbcast.lane.b32.xlu0 %v1085_v2, 368 }
 0x204   : > { %1206 = vbcast.lane.b32.xlu1 %v1152_v55, 360  ;;  %1147 = vbcast.lane.b32.xlu0 %v1085_v2, 376 }
 0x208   : > { %1210 = vbcast.lane.b32.xlu1 %v1152_v55, 368 }
 0x20c   : > { %1214 = vbcast.lane.b32.xlu1 %v1152_v55, 376 }
 0x23e   : > { %v1092_v9 = vpop.permute.xlu1 %1091  ;;  %v1088_v10 = vpop.permute.xlu0 %1087 }
 0x23f   : > { %v1217_v38 = vsub.f32 %v2532_v49, %v1092_v9  ;;  %v1216_v22 = vsub.f32 %v2515_v35, %v1088_v10  ;;  %v1582_v35 = vcombine.high %v2079_v18, %v2079_v18 }
 0x241   : > { %v1250_v24 = vmul.f32 1.442695, %v1217_v38  ;;  %v1248_v31 = vmul.f32 1.442695, %v1216_v22  ;;  %v1596_v45 = vrot.slane %v1582_v35, %v1588_v34 }
 0x242   : > { %v1155_v47 = vpop.permute.xlu1 %1154  ;;  %v1096_v42 = vpop.permute.xlu0 %1095 }
 0x243   : > { %2215 = vpow2.f32 %v1250_v24  ;;  %v1232_v62 = vsub.f32 %v2517_v36, %v1155_v47  ;;  %v1218_v11 = vsub.f32 %v2506_v27, %v1096_v42  ;;  %v2822_v36 = vrot.slane %v1589_v59, %v2796_v48 }
 0x244   : > { %2217 = vpow2.f32 %v1248_v31 }
 0x245   : > { %v1280_v49 = vmul.f32 1.442695, %v1232_v62  ;;  %v1252_v51 = vmul.f32 1.442695, %v1218_v11 }
 0x246   : > { %v1159_v15 = vpop.permute.xlu1 %1158  ;;  %v1100_v2 = vpop.permute.xlu0 %1099 }
 0x247   : > { %2219 = vpow2.f32 %v1280_v49  ;;  %v1233_v55 = vsub.f32 %v2534_v50, %v1159_v15  ;;  %v1219_v21 = vsub.f32 %v2524_v40, %v1100_v2  ;;  %v2827_v40 = vrot.slane %v1596_v45, %v2796_v48 }
 0x248   : > { %2221 = vpow2.f32 %v1252_v51 }
 0x249   : > { %v1282_v54 = vmul.f32 1.442695, %v1233_v55  ;;  %v1254_v5 = vmul.f32 1.442695, %v1219_v21 }
 0x24a   : > { %v1163_v27 = vpop.permute.xlu1 %1162  ;;  %v1104_v9 = vpop.permute.xlu0 %1103 }
 0x24b   : > { %2223 = vpow2.f32 %v1282_v54  ;;  %v1234_v10 = vsub.f32 %v2508_v29, %v1163_v27  ;;  %v1220_v38 = vsub.f32 %v2547_v63, %v1104_v9 }
 0x24c   : > { %2225 = vpow2.f32 %v1254_v5 }
 0x24d   : > { %v2216_v22 = vpop.eup %2215  ;;  %v1284_v24 = vmul.f32 1.442695, %v1234_v10  ;;  %v1256_v50 = vmul.f32 1.442695, %v1220_v38 }
 0x24e   : > { %v2218_v31 = vpop.eup %2217  ;;  %1316 = vadd.xlane.f32.xlu1 %v2216_v22  ;;  %v1167_v34 = vpop.permute.xlu1 %1166  ;;  %v2830_v42 = vmul.f32 %v2216_v22, %v2822_v36 }
 0x24f   : > { %v1108_v47 = vpop.permute.xlu0 %1107  ;;  %2227 = vpow2.f32 %v1284_v24  ;;  %v1235_v18 = vsub.f32 %v2526_v43, %v1167_v34  ;;  %1314 = vadd.xlane.f32.xlu0 %v2218_v31  ;;  %v2835_v63 = vmul.f32 %v2218_v31, %v2822_v36 }
 0x250   : > { %v1221_v29 = vsub.f32 %v2564_v13, %v1108_v47  ;;  %2229 = vpow2.f32 %v1256_v50 }
 0x251   : > { %v2220_v62 = vpop.eup %2219  ;;  %v1286_v11 = vmul.f32 1.442695, %v1235_v18 }
 0x252   : > { %v1258_v48 = vmul.f32 1.442695, %v1221_v29  ;;  %v2222_v49 = vpop.eup %2221  ;;  %v1171_v51 = vpop.permute.xlu1 %1170  ;;  %v2838_v59 = vmul.f32 %v2220_v62, %v2827_v40 }
 0x253   : > { %v1112_v35 = vpop.permute.xlu0 %1111  ;;  %2231 = vpow2.f32 %v1286_v11  ;;  %v1236_v15 = vsub.f32 %v2549_v0, %v1171_v51  ;;  %1346 = vadd.xlane.f32.xlu0 %v2220_v62  ;;  %v2843_v13 = vmul.f32 %v2222_v49, %v2822_v36 }
 0x254   : > { %v1222_v43 = vsub.f32 %v2539_v52, %v1112_v35  ;;  %2233 = vpow2.f32 %v1258_v48 }
 0x255   : > { %v2224_v2 = vpop.eup %2223  ;;  %v1288_v55 = vmul.f32 1.442695, %v1236_v15 }
 0x256   : > { %v1260_v21 = vmul.f32 1.442695, %v1222_v43  ;;  %v2226_v54 = vpop.eup %2225  ;;  %v1175_v5 = vpop.permute.xlu1 %1174  ;;  %v2846_v27 = vmul.f32 %v2224_v2, %v2827_v40 }
 0x257   : > { %v1116_v45 = vpop.permute.xlu0 %1115  ;;  %2235 = vpow2.f32 %v1288_v55  ;;  %v1237_v9 = vsub.f32 %v2566_v14, %v1175_v5  ;;  %1348 = vadd.xlane.f32.xlu0 %v2224_v2  ;;  %v2851_v52 = vmul.f32 %v2226_v54, %v2822_v36 }
 0x258   : > { %v1223_v0 = vsub.f32 %v2556_v4, %v1116_v45  ;;  %2237 = vpow2.f32 %v1260_v21 }
 0x259   : > { %v2228_v10 = vpop.eup %2227  ;;  %v1290_v38 = vmul.f32 1.442695, %v1237_v9 }
 0x25a   : > { %v1262_v22 = vmul.f32 1.442695, %v1223_v0  ;;  %v2230_v24 = vpop.eup %2229  ;;  %1350 = vadd.xlane.f32.xlu1 %v2228_v10  ;;  %v1179_v50 = vpop.permute.xlu1 %1178  ;;  %v2854_v34 = vmul.f32 %v2228_v10, %v2827_v40 }
 0x25b   : > { %v1120_v31 = vpop.permute.xlu0 %1119  ;;  %2239 = vpow2.f32 %v1290_v38  ;;  %v1238_v14 = vsub.f32 %v2541_v53, %v1179_v50  ;;  %1318 = vadd.xlane.f32.xlu0 %v2222_v49  ;;  %v2859_v47 = vmul.f32 %v2230_v24, %v2822_v36 }
 0x25c   : > { %v1224_v4 = vsub.f32 %v2579_v19, %v1120_v31  ;;  %2241 = vpow2.f32 %v1262_v22 }
 0x25d   : > { %v2232_v18 = vpop.eup %2231  ;;  %v1292_v29 = vmul.f32 1.442695, %v1238_v14 }
 0x25e   : > { %v1264_v62 = vmul.f32 1.442695, %v1224_v4  ;;  %v2234_v11 = vpop.eup %2233  ;;  %1352 = vadd.xlane.f32.xlu1 %v2232_v18  ;;  %v1183_v48 = vpop.permute.xlu1 %1182  ;;  %v2862_v35 = vmul.f32 %v2232_v18, %v2827_v40 }
 0x25f   : > { %v1124_v51 = vpop.permute.xlu0 %1123  ;;  %2243 = vpow2.f32 %v1292_v29  ;;  %v1239_v53 = vsub.f32 %v2558_v7, %v1183_v48  ;;  %1320 = vadd.xlane.f32.xlu0 %v2226_v54  ;;  %v2867_v49 = vmul.f32 %v2234_v11, %v2822_v36 }
 0x260   : > { %v1225_v19 = vsub.f32 %v2596_v28, %v1124_v51  ;;  %2245 = vpow2.f32 %v1264_v62 }
 0x261   : > { %v2236_v15 = vpop.eup %2235  ;;  %v1294_v43 = vmul.f32 1.442695, %v1239_v53 }
 0x262   : > { %v1266_v2 = vmul.f32 1.442695, %v1225_v19  ;;  %v2238_v55 = vpop.eup %2237  ;;  %1354 = vadd.xlane.f32.xlu1 %v2236_v15  ;;  %v1187_v21 = vpop.permute.xlu1 %1186  ;;  %v2870_v45 = vmul.f32 %v2236_v15, %v2827_v40 }
 0x263   : > { %v1128_v5 = vpop.permute.xlu0 %1127  ;;  %2247 = vpow2.f32 %v1294_v43  ;;  %v1240_v7 = vsub.f32 %v2581_v20, %v1187_v21  ;;  %1322 = vadd.xlane.f32.xlu0 %v2230_v24  ;;  %v2875_v54 = vmul.f32 %v2238_v55, %v2822_v36 }
 0x264   : > { %v1226_v28 = vsub.f32 %v2571_v16, %v1128_v5  ;;  %2249 = vpow2.f32 %v1266_v2 }
 0x265   : > { %v2240_v9 = vpop.eup %2239  ;;  %v1296_v0 = vmul.f32 1.442695, %v1240_v7 }
 0x266   : > { %v1268_v10 = vmul.f32 1.442695, %v1226_v28  ;;  %v2242_v38 = vpop.eup %2241  ;;  %1356 = vadd.xlane.f32.xlu1 %v2240_v9  ;;  %v1191_v22 = vpop.permute.xlu1 %1190  ;;  %v2878_v31 = vmul.f32 %v2240_v9, %v2827_v40 }
 0x267   : > { %v1132_v50 = vpop.permute.xlu0 %1131  ;;  %2251 = vpow2.f32 %v1296_v0  ;;  %v1241_v20 = vsub.f32 %v2598_v30, %v1191_v22  ;;  %1324 = vadd.xlane.f32.xlu0 %v2234_v11  ;;  %v2883_v24 = vmul.f32 %v2242_v38, %v2822_v36 }
 0x268   : > { %v1227_v16 = vsub.f32 %v2588_v25, %v1132_v50  ;;  %2253 = vpow2.f32 %v1268_v10 }
 0x269   : > { %v2244_v14 = vpop.eup %2243  ;;  %v1298_v4 = vmul.f32 1.442695, %v1241_v20  ;;  %v3166_v20 = vld [vmem:[#allocation11_spill] sm:$0xff] }
 0x26a   : > { %v1270_v18 = vmul.f32 1.442695, %v1227_v16  ;;  %v2246_v29 = vpop.eup %2245  ;;  %1358 = vadd.xlane.f32.xlu1 %v2244_v14  ;;  %v1195_v62 = vpop.permute.xlu1 %1194  ;;  %v2886_v51 = vmul.f32 %v2244_v14, %v2827_v40 }
 0x26b   : > { %v1136_v48 = vpop.permute.xlu0 %1135  ;;  %2255 = vpow2.f32 %v1298_v4  ;;  %v1242_v30 = vsub.f32 %v2573_v17, %v1195_v62  ;;  %1326 = vadd.xlane.f32.xlu0 %v2238_v55  ;;  %v2891_v11 = vmul.f32 %v2246_v29, %v2822_v36 }
 0x26c   : > { %v1228_v25 = vsub.f32 %v2611_v37, %v1136_v48  ;;  %2257 = vpow2.f32 %v1270_v18 }
 0x26d   : > { %v2248_v53 = vpop.eup %2247  ;;  %v1300_v19 = vmul.f32 1.442695, %v1242_v30 }
 0x26e   : > { %v1272_v15 = vmul.f32 1.442695, %v1228_v25  ;;  %v2250_v43 = vpop.eup %2249  ;;  %1360 = vadd.xlane.f32.xlu1 %v2248_v53  ;;  %v1199_v2 = vpop.permute.xlu1 %1198  ;;  %v2894_v5 = vmul.f32 %v2248_v53, %v2827_v40  ;;  %v3168_v53 = vld [vmem:[#allocation14_spill] sm:$0xff] }
 0x26f   : > { %v1140_v21 = vpop.permute.xlu0 %1139  ;;  %2259 = vpow2.f32 %v1300_v19  ;;  %v1243_v17 = vsub.f32 %v2590_v26, %v1199_v2  ;;  %1328 = vadd.xlane.f32.xlu0 %v2242_v38  ;;  %v2899_v55 = vmul.f32 %v2250_v43, %v2822_v36  ;;  %v3167_v38 = vld [vmem:[#allocation9_spill] sm:$0xff] }
 0x270   : > { %v1229_v37 = vsub.f32 %v2626_v44, %v1140_v21  ;;  %2261 = vpow2.f32 %v1272_v15 }
 0x271   : > { %v2252_v7 = vpop.eup %2251  ;;  %v1302_v28 = vmul.f32 1.442695, %v1243_v17 }
 0x272   : > { %v1274_v9 = vmul.f32 1.442695, %v1229_v37  ;;  %v2254_v0 = vpop.eup %2253  ;;  %1362 = vadd.xlane.f32.xlu1 %v2252_v7  ;;  %v1203_v10 = vpop.permute.xlu1 %1202  ;;  %v2902_v50 = vmul.f32 %v2252_v7, %v2827_v40 }
 0x273   : > { %v1144_v22 = vpop.permute.xlu0 %1143  ;;  %2263 = vpow2.f32 %v1302_v28  ;;  %v1244_v26 = vsub.f32 %v3166_v20, %v1203_v10  ;;  %1330 = vadd.xlane.f32.xlu0 %v2246_v29  ;;  %v2907_v16 = vmul.f32 %v2254_v0, %v2822_v36  ;;  %v3169_v29 = vld [vmem:[#allocation12_spill] sm:$0xff]  ;;  %v3170_v10 = vld [vmem:[#allocation10_spill] sm:$0xff] }
 0x274   : > { %v1230_v44 = vsub.f32 %v3167_v38, %v1144_v22  ;;  %2265 = vpow2.f32 %v1274_v9 }
 0x275   : > { %v2256_v14 = vpop.eup %2255  ;;  %v1304_v4 = vmul.f32 1.442695, %v1244_v26 }
 0x276   : > { %v1276_v18 = vmul.f32 1.442695, %v1230_v44  ;;  %v2258_v62 = vpop.eup %2257  ;;  %1364 = vadd.xlane.f32.xlu1 %v2256_v14  ;;  %v1207_v48 = vpop.permute.xlu1 %1206  ;;  %v2910_v25 = vmul.f32 %v2256_v14, %v2827_v40 }
 0x277   : > { %v1148_v30 = vpop.permute.xlu0 %1147  ;;  %2267 = vpow2.f32 %v1304_v4  ;;  %v1245_v19 = vsub.f32 %v3168_v53, %v1207_v48  ;;  %1332 = vadd.xlane.f32.xlu0 %v2250_v43  ;;  %v2915_v2 = vmul.f32 %v2258_v62, %v2822_v36  ;;  %v3171_v4 = vld [vmem:[#allocation13_spill] sm:$0xff] }
 0x278   : > { %v1231_v15 = vsub.f32 %v3169_v29, %v1148_v30  ;;  %2269 = vpow2.f32 %v1276_v18 }
 0x279   : > { %v2260_v21 = vpop.eup %2259  ;;  %v1306_v17 = vmul.f32 1.442695, %v1245_v19 }
 0x27a   : > { %v1278_v37 = vmul.f32 1.442695, %v1231_v15  ;;  %v2262_v7 = vpop.eup %2261  ;;  %1366 = vadd.xlane.f32.xlu1 %v2260_v21  ;;  %v1211_v28 = vpop.permute.xlu1 %1210  ;;  %v1633_v9 = vmul.f32 %v2260_v21, %v2827_v40 }
 0x27b   : > { %2271 = vpow2.f32 %v1306_v17  ;;  %v1246_v22 = vsub.f32 %v3170_v10, %v1211_v28  ;;  %1334 = vadd.xlane.f32.xlu0 %v2254_v0  ;;  %v1619_v43 = vmul.f32 %v2262_v7, %v2822_v36 }
 0x27c   : > { %2273 = vpow2.f32 %v1278_v37 }
 0x27d   : > { %v2264_v20 = vpop.eup %2263  ;;  %v1308_v26 = vmul.f32 1.442695, %v1246_v22 }
 0x27e   : > { %v2266_v38 = vpop.eup %2265  ;;  %1368 = vadd.xlane.f32.xlu1 %v2264_v20  ;;  %v1215_v44 = vpop.permute.xlu1 %1214  ;;  %v1634_v14 = vmul.f32 %v2264_v20, %v2827_v40 }
 0x27f   : > { %2275 = vpow2.f32 %v1308_v26  ;;  %v1247_v18 = vsub.f32 %v3171_v4, %v1215_v44  ;;  %1336 = vadd.xlane.f32.xlu0 %v2258_v62  ;;  %v1620_v48 = vmul.f32 %v2266_v38, %v2822_v36  ;;  %v3173_v26 = vld [vmem:[#allocation16_spill] sm:$0xff]  ;;  %v3174_v44 = vld [vmem:[#allocation17_spill] sm:$0xff] }
 0x281   : > { %v2268_v30 = vpop.eup %2267  ;;  %v1310_v53 = vmul.f32 1.442695, %v1247_v18 }
 0x282   : > { %v2270_v19 = vpop.eup %2269  ;;  %1370 = vadd.xlane.f32.xlu1 %v2268_v30  ;;  %v1635_v0 = vmul.f32 %v2268_v30, %v2827_v40 }
 0x283   : > { %2277 = vpow2.f32 %v1310_v53  ;;  %1338 = vadd.xlane.f32.xlu0 %v2262_v7  ;;  %v1621_v29 = vmul.f32 %v2270_v19, %v2822_v36  ;;  %v3172_v7 = vld [vmem:[#allocation15_spill] sm:$0xff] }
 0x285   : > { %v2272_v15 = vpop.eup %2271 }
 0x286   : > { %v2274_v21 = vpop.eup %2273  ;;  %1372 = vadd.xlane.f32.xlu1 %v2272_v15  ;;  %v1636_v17 = vmul.f32 %v2272_v15, %v2827_v40 }
 0x287   : > { %1340 = vadd.xlane.f32.xlu0 %v2266_v38  ;;  %v1622_v62 = vmul.f32 %v2274_v21, %v2822_v36 }
 0x289   : > { %v2276_v37 = vpop.eup %2275 }
 0x28a   : > { %1374 = vadd.xlane.f32.xlu1 %v2276_v37  ;;  %v1637_v28 = vmul.f32 %v2276_v37, %v2827_v40 }
 0x28b   : > { %1342 = vadd.xlane.f32.xlu0 %v2270_v19 }
 0x28d   : > { %v2278_v10 = vpop.eup %2277 }
 0x28e   : > { %1376 = vadd.xlane.f32.xlu1 %v2278_v10  ;;  %v1638_v22 = vmul.f32 %v2278_v10, %v2827_v40 }
 0x28f   : > { %1344 = vadd.xlane.f32.xlu0 %v2274_v21 }
 0x292   : > { %1641 = vadd.xlane.f32.xlu1 %v2830_v42 }
 0x293   : > { %1639 = vadd.xlane.f32.xlu0 %v2835_v63 }
 0x296   : > { %1673 = vadd.xlane.f32.xlu1 %v2846_v27 }
 0x297   : > { %1671 = vadd.xlane.f32.xlu0 %v2838_v59 }
 0x29a   : > { %1675 = vadd.xlane.f32.xlu1 %v2854_v34 }
 0x29b   : > { %1643 = vadd.xlane.f32.xlu0 %v2843_v13 }
 0x29e   : > { %1677 = vadd.xlane.f32.xlu1 %v2862_v35 }
 0x29f   : > { %1645 = vadd.xlane.f32.xlu0 %v2851_v52 }
 0x2a2   : > { %1679 = vadd.xlane.f32.xlu1 %v2870_v45 }
 0x2a3   : > { %1647 = vadd.xlane.f32.xlu0 %v2859_v47 }
 0x2a6   : > { %1681 = vadd.xlane.f32.xlu1 %v2878_v31 }
 0x2a7   : > { %1649 = vadd.xlane.f32.xlu0 %v2867_v49 }
 0x2aa   : > { %1683 = vadd.xlane.f32.xlu1 %v2886_v51 }
 0x2ab   : > { %1651 = vadd.xlane.f32.xlu0 %v2875_v54 }
 0x2ae   : > { %1685 = vadd.xlane.f32.xlu1 %v2894_v5 }
 0x2af   : > { %1653 = vadd.xlane.f32.xlu0 %v2883_v24 }
 0x2b2   : > { %1687 = vadd.xlane.f32.xlu1 %v2902_v50 }
 0x2b3   : > { %1655 = vadd.xlane.f32.xlu0 %v2891_v11 }
 0x2b6   : > { %1689 = vadd.xlane.f32.xlu1 %v2910_v25 }
 0x2b7   : > { %1657 = vadd.xlane.f32.xlu0 %v2899_v55 }
 0x2ba   : > { %1691 = vadd.xlane.f32.xlu1 %v1633_v9 }
 0x2bb   : > { %1659 = vadd.xlane.f32.xlu0 %v2907_v16 }
 0x2be   : > { %1693 = vadd.xlane.f32.xlu1 %v1634_v14 }
 0x2bf   : > { %1661 = vadd.xlane.f32.xlu0 %v2915_v2  ;;  %v1080_v2 = vmul.f32 1.442695, %v1079_v57 }
 0x2c1   : > { %2279 = vpow2.f32 %v1080_v2 }
 0x2c2   : > { %1695 = vadd.xlane.f32.xlu1 %v1635_v0 }
 0x2c3   : > { %1663 = vadd.xlane.f32.xlu0 %v1619_v43 }
 0x2c6   : > { %1697 = vadd.xlane.f32.xlu1 %v1636_v17 }
 0x2c7   : > { %1665 = vadd.xlane.f32.xlu0 %v1620_v48 }
 0x2ca   : > { %1699 = vadd.xlane.f32.xlu1 %v1637_v28 }
 0x2cb   : > { %1667 = vadd.xlane.f32.xlu0 %v1621_v29 }
 0x2ce   : > { %1701 = vadd.xlane.f32.xlu1 %v1638_v22 }
 0x2cf   : > { %1669 = vadd.xlane.f32.xlu0 %v1622_v62 }
 0x2db   : > { %v1317_v42 = vpop.xlane.xlu1 %1316 }
 0x2dc   : > { %v1315_v36 = vpop.xlane.xlu0 %1314  ;;  %v1417_v20 = vrot.slane %v1317_v42, %v3172_v7 }
 0x2dd   : > { %v1413_v38 = vrot.slane %v1315_v36, %v3173_v26 }
 0x2df   : > { %v1418_v29 = vsel %vm896_vm3, %v1417_v20, %v1413_v38 }
 0x2e0   : > { %v1347_v40 = vpop.xlane.xlu0 %1346 }
 0x2e1   : > { %v1492_v4 = vrot.slane %v1347_v40, %v3173_v26 }
 0x2e4   : > { %v1349_v63 = vpop.xlane.xlu0 %1348 }
 0x2e5   : > { %v1496_v9 = vrot.slane %v1349_v63, %v3172_v7 }
 0x2e7   : > { %v1351_v59 = vpop.xlane.xlu1 %1350  ;;  %v1497_v57 = vsel %vm896_vm3, %v1496_v9, %v1492_v4 }
 0x2e8   : > { %v1319_v13 = vpop.xlane.xlu0 %1318  ;;  %v1501_v14 = vrot.slane %v1351_v59, %v3174_v44 }
 0x2e9   : > { %v1422_v18 = vrot.slane %v1319_v13, %v3174_v44 }
 0x2ea   : > { %v1502_v15 = vsel %vm903_vm4, %v1501_v14, %v1497_v57 }
 0x2eb   : > { %v1353_v27 = vpop.xlane.xlu1 %1352  ;;  %v1423_v62 = vsel %vm903_vm4, %v1422_v18, %v1418_v29 }
 0x2ec   : > { %v1321_v52 = vpop.xlane.xlu0 %1320  ;;  %v1506_v48 = vrot.slane %v1353_v27, %v2671_v58 }
 0x2ed   : > { %v1427_v30 = vrot.slane %v1321_v52, %v2671_v58 }
 0x2ee   : > { %v1507_v37 = vsel %vm910_vm5, %v1506_v48, %v1502_v15  ;;  %v3002_v48 = vpop.eup %2279 }
 0x2ef   : > { %v1355_v34 = vpop.xlane.xlu1 %1354  ;;  %v1428_v22 = vsel %vm910_vm5, %v1427_v30, %v1423_v62 }
 0x2f0   : > { %v1323_v47 = vpop.xlane.xlu0 %1322  ;;  %v1511_v23 = vrot.slane %v1355_v34, %v2668_v33 }
 0x2f1   : > { %v1432_v53 = vrot.slane %v1323_v47, %v2668_v33 }
 0x2f2   : > { %v1512_v36 = vsel %vm917_vm6, %v1511_v23, %v1507_v37 }
 0x2f3   : > { %v1357_v35 = vpop.xlane.xlu1 %1356  ;;  %v1433_v59 = vsel %vm917_vm6, %v1432_v53, %v1428_v22 }
 0x2f4   : > { %v1325_v49 = vpop.xlane.xlu0 %1324  ;;  %v1516_v19 = vrot.slane %v1357_v35, %v2675_v41 }
 0x2f5   : > { %v1437_v21 = vrot.slane %v1325_v49, %v2675_v41 }
 0x2f6   : > { %v1517_v13 = vsel %vm924_vm7, %v1516_v19, %v1512_v36 }
 0x2f7   : > { %v1359_v45 = vpop.xlane.xlu1 %1358  ;;  %v1438_v47 = vsel %vm924_vm7, %v1437_v21, %v1433_v59  ;;  %v1312_v21 = vld [vmem:[#allocation3] sm:$0x3] }
 0x2f8   : > { %v1327_v54 = vpop.xlane.xlu0 %1326  ;;  %v1521_v17 = vrot.slane %v1359_v45, %v2696_v32  ;;  %v1313_v36 = vmul.f32 %v3002_v48, %v1312_v21 }
 0x2f9   : > { %v1442_v28 = vrot.slane %v1327_v54, %v2696_v32 }
 0x2fa   : > { %v1522_v35 = vsel %vm931_vm8, %v1521_v17, %v1517_v13 }
 0x2fb   : > { %v1361_v31 = vpop.xlane.xlu1 %1360  ;;  %v1443_v54 = vsel %vm931_vm8, %v1442_v28, %v1438_v47 }
 0x2fc   : > { %v1329_v24 = vpop.xlane.xlu0 %1328  ;;  %v1526_v10 = vrot.slane %v1361_v31, %v2703_v1 }
 0x2fd   : > { %v1447_v40 = vrot.slane %v1329_v24, %v2703_v1 }
 0x2fe   : > { %v1527_v31 = vsel %vm938_vm9, %v1526_v10, %v1522_v35 }
 0x2ff   : > { %v1363_v51 = vpop.xlane.xlu1 %1362 }
 0x300   : > { %v1331_v11 = vpop.xlane.xlu0 %1330  ;;  %v1531_v42 = vrot.slane %v1363_v51, %v2706_v6 }
 0x301   : > { %v1452_v27 = vrot.slane %v1331_v11, %v2706_v6  ;;  %v1448_v11 = vsel %vm938_vm9, %v1447_v40, %v1443_v54 }
 0x303   : > { %v1365_v5 = vpop.xlane.xlu1 %1364 }
 0x304   : > { %v1333_v55 = vpop.xlane.xlu0 %1332  ;;  %v1536_v52 = vrot.slane %v1365_v5, %v2711_v8  ;;  %v1532_v5 = vsel %vm945_vm10, %v1531_v42, %v1527_v31 }
 0x305   : > { %v1457_v49 = vrot.slane %v1333_v55, %v2711_v8  ;;  %v1453_v55 = vsel %vm945_vm10, %v1452_v27, %v1448_v11 }
 0x307   : > { %v1367_v50 = vpop.xlane.xlu1 %1366 }
 0x308   : > { %v1335_v16 = vpop.xlane.xlu0 %1334  ;;  %v1541_v45 = vrot.slane %v1367_v50, %v2737_v56  ;;  %v1537_v50 = vsel %vm952_vm11, %v1536_v52, %v1532_v5 }
 0x309   : > { %v1462_v24 = vrot.slane %v1335_v16, %v2737_v56 }
 0x30a   : > { %v1542_v4 = vsel %vm959_vm12, %v1541_v45, %v1537_v50 }
 0x30b   : > { %v1369_v25 = vpop.xlane.xlu1 %1368 }
 0x30c   : > { %v1337_v43 = vpop.xlane.xlu0 %1336  ;;  %v1546_v51 = vrot.slane %v1369_v25, %v2746_v3  ;;  %v1458_v25 = vsel %vm952_vm11, %v1457_v49, %v1453_v55 }
 0x30d   : > { %v1467_v2 = vrot.slane %v1337_v43, %v2746_v3  ;;  %v1463_v30 = vsel %vm959_vm12, %v1462_v24, %v1458_v25 }
 0x30e   : > { %v1547_v23 = vsel %vm966_vm13, %v1546_v51, %v1542_v4 }
 0x30f   : > { %v1371_v39 = vpop.xlane.xlu1 %1370  ;;  %v1468_v57 = vsel %vm966_vm13, %v1467_v2, %v1463_v30 }
 0x310   : > { %v1339_v0 = vpop.xlane.xlu0 %1338  ;;  %v1551_v9 = vrot.slane %v1371_v39, %v2749_v12 }
 0x311   : > { %v1472_v38 = vrot.slane %v1339_v0, %v2749_v12 }
 0x312   : > { %v1552_v53 = vsel %vm973_vm14, %v1551_v9, %v1547_v23 }
 0x313   : > { %v1373_v63 = vpop.xlane.xlu1 %1372  ;;  %v1473_v0 = vsel %vm973_vm14, %v1472_v38, %v1468_v57 }
 0x314   : > { %v1341_v34 = vpop.xlane.xlu0 %1340  ;;  %v1556_v14 = vrot.slane %v1373_v63, %v2763_v61 }
 0x315   : > { %v1477_v18 = vrot.slane %v1341_v34, %v2763_v61 }
 0x316   : > { %v1557_v29 = vsel %vm980_vm15, %v1556_v14, %v1552_v53 }
 0x317   : > { %v1375_v20 = vpop.xlane.xlu1 %1374  ;;  %v1478_v62 = vsel %vm980_vm15, %v1477_v18, %v1473_v0 }
 0x318   : > { %v1343_v16 = vpop.xlane.xlu0 %1342  ;;  %v1561_v43 = vrot.slane %v1375_v20, %v2760_v60 }
 0x319   : > { %v1482_v39 = vrot.slane %v1343_v16, %v2760_v60 }
 0x31a   : > { %v1562_v37 = vsel %vm987_vm1, %v1561_v43, %v1557_v29 }
 0x31b   : > { %v1377_v19 = vpop.xlane.xlu1 %1376  ;;  %v1483_v10 = vsel %vm987_vm1, %v1482_v39, %v1478_v62 }
 0x31c   : > { %v1566_v15 = vrot.slane %v1377_v19, %v2772_v46  ;;  %v1345_v17 = vpop.xlane.xlu0 %1344 }
 0x31d   : > { %v1487_v28 = vrot.slane %v1345_v17, %v2772_v46 }
 0x31e   : > { %v1567_v22 = vsel %vm994_vm2, %v1566_v15, %v1562_v37 }
 0x31f   : > { %v1488_v40 = vsel %vm994_vm2, %v1487_v28, %v1483_v10  ;;  %v1642_v42 = vpop.xlane.xlu1 %1641 }
 0x320   : > { %v1568_v63 = vsel %vm1075_vm0, %v1567_v22, %v1488_v40  ;;  %v1640_v59 = vpop.xlane.xlu0 %1639  ;;  %v1742_v43 = vrot.slane %v1642_v42, %v3172_v7 }
 0x321   : > { %v1570_v13 = vadd.f32 %v1568_v63, %v1313_v36  ;;  %v1738_v30 = vrot.slane %v1640_v59, %v3173_v26 }
 0x323   : > { %1571 = vst [vmem:[#allocation3] sm:$0x3] %v1570_v13  ;;  %v1674_v27 = vpop.xlane.xlu1 %1673 }
 0x324   : > { %v1672_v52 = vpop.xlane.xlu0 %1671  ;;  %v1821_v25 = vrot.slane %v1674_v27, %v3172_v7 }
 0x325   : > { %v1817_v4 = vrot.slane %v1672_v52, %v3173_v26  ;;  %v1743_v26 = vsel %vm896_vm3, %v1742_v43, %v1738_v30 }
 0x327   : > { %v1676_v34 = vpop.xlane.xlu1 %1675  ;;  %v1822_v29 = vsel %vm896_vm3, %v1821_v25, %v1817_v4  ;;  %vm3175_vm3 = vcmask 1041408  }
 0x328   : > { %v1644_v47 = vpop.xlane.xlu0 %1643  ;;  %v1826_v23 = vrot.slane %v1676_v34, %v3174_v44 }
 0x329   : > { %v1747_v39 = vrot.slane %v1644_v47, %v3174_v44 }
 0x32a   : > { %v1827_v17 = vsel %vm903_vm4, %v1826_v23, %v1822_v29 }
 0x32b   : > { %v1678_v35 = vpop.xlane.xlu1 %1677 }
 0x32c   : > { %v1646_v49 = vpop.xlane.xlu0 %1645  ;;  %v1831_v57 = vrot.slane %v1678_v35, %v2671_v58 }
 0x32d   : > { %v1752_v53 = vrot.slane %v1646_v49, %v2671_v58  ;;  %v1748_v58 = vsel %vm903_vm4, %v1747_v39, %v1743_v26 }
 0x32e   : > { %v1832_v37 = vsel %vm910_vm5, %v1831_v57, %v1827_v17 }
 0x32f   : > { %v1680_v45 = vpop.xlane.xlu1 %1679 }
 0x330   : > { %v1648_v54 = vpop.xlane.xlu0 %1647  ;;  %v1836_v19 = vrot.slane %v1680_v45, %v2668_v33 }
 0x331   : > { %v1757_v15 = vrot.slane %v1648_v54, %v2668_v33  ;;  %v1753_v33 = vsel %vm910_vm5, %v1752_v53, %v1748_v58 }
 0x332   : > { %v1837_v22 = vsel %vm917_vm6, %v1836_v19, %v1832_v37 }
 0x333   : > { %v1682_v31 = vpop.xlane.xlu1 %1681 }
 0x334   : > { %v1650_v24 = vpop.xlane.xlu0 %1649  ;;  %v1841_v21 = vrot.slane %v1682_v31, %v2675_v41 }
 0x335   : > { %v1762_v44 = vrot.slane %v1650_v24, %v2675_v41  ;;  %v1758_v41 = vsel %vm917_vm6, %v1757_v15, %v1753_v33 }
 0x336   : > { %v1842_v63 = vsel %vm924_vm7, %v1841_v21, %v1837_v22 }
 0x337   : > { %v1684_v51 = vpop.xlane.xlu1 %1683  ;;  %v1763_v27 = vsel %vm924_vm7, %v1762_v44, %v1758_v41 }
 0x338   : > { %v1652_v11 = vpop.xlane.xlu0 %1651  ;;  %v1846_v62 = vrot.slane %v1684_v51, %v2696_v32 }
 0x339   : > { %v1767_v28 = vrot.slane %v1652_v11, %v2696_v32 }
 0x33a   : > { %v1847_v52 = vsel %vm931_vm8, %v1846_v62, %v1842_v63 }
 0x33b   : > { %v1686_v5 = vpop.xlane.xlu1 %1685  ;;  %v1768_v47 = vsel %vm931_vm8, %v1767_v28, %v1763_v27  ;;  %v1914_v28 = vstv %s1913_s3 }
 0x33c   : > { %v1654_v2 = vpop.xlane.xlu0 %1653  ;;  %v1851_v10 = vrot.slane %v1686_v5, %v2703_v1 }
 0x33d   : > { %v1772_v36 = vrot.slane %v1654_v2, %v2703_v1 }
 0x33e   : > { %v1852_v35 = vsel %vm938_vm9, %v1851_v10, %v1847_v52 }
 0x33f   : > { %v1688_v9 = vpop.xlane.xlu1 %1687 }
 0x340   : > { %v1656_v20 = vpop.xlane.xlu0 %1655  ;;  %v1856_v40 = vrot.slane %v1688_v9, %v2706_v6 }
 0x341   : > { %v1777_v59 = vrot.slane %v1656_v20, %v2706_v6  ;;  %v1773_v6 = vsel %vm938_vm9, %v1772_v36, %v1768_v47 }
 0x342   : > { %v1857_v54 = vsel %vm945_vm10, %v1856_v40, %v1852_v35 }
 0x343   : > { %v1690_v55 = vpop.xlane.xlu1 %1689 }
 0x344   : > { %v1658_v50 = vpop.xlane.xlu0 %1657  ;;  %v1861_v13 = vrot.slane %v1690_v55, %v2711_v8 }
 0x345   : > { %v1782_v34 = vrot.slane %v1658_v50, %v2711_v8  ;;  %v1778_v8 = vsel %vm945_vm10, %v1777_v59, %v1773_v6 }
 0x346   : > { %v1862_v11 = vsel %vm952_vm11, %v1861_v13, %v1857_v54 }
 0x347   : > { %v1692_v38 = vpop.xlane.xlu1 %1691  ;;  %v1783_v9 = vsel %vm952_vm11, %v1782_v34, %v1778_v8 }
 0x348   : > { %v1660_v14 = vpop.xlane.xlu0 %1659  ;;  %v1866_v1 = vrot.slane %v1692_v38, %v2737_v56 }
 0x349   : > { %v1787_v49 = vrot.slane %v1660_v14, %v2737_v56 }
 0x34a   : > { %v1867_v20 = vsel %vm959_vm12, %v1866_v1, %v1862_v11 }
 0x34b   : > { %v1694_v16 = vpop.xlane.xlu1 %1693  ;;  %v1788_v50 = vsel %vm959_vm12, %v1787_v49, %v1783_v9 }
 0x34c   : > { %v1662_v18 = vpop.xlane.xlu0 %1661  ;;  %v1871_v45 = vrot.slane %v1694_v16, %v2746_v3 }
 0x34d   : > { %v1792_v31 = vrot.slane %v1662_v18, %v2746_v3 }
 0x34e   : > { %v1872_v38 = vsel %vm966_vm13, %v1871_v45, %v1867_v20 }
 0x34f   : > { %v1696_v0 = vpop.xlane.xlu1 %1695  ;;  %v1793_v16 = vsel %vm966_vm13, %v1792_v31, %v1788_v50 }
 0x350   : > { %v1664_v7 = vpop.xlane.xlu0 %1663  ;;  %v1876_v24 = vrot.slane %v1696_v0, %v2749_v12 }
 0x351   : > { %v1797_v5 = vrot.slane %v1664_v7, %v2749_v12 }
 0x352   : > { %v1877_v12 = vsel %vm973_vm14, %v1876_v24, %v1872_v38 }
 0x353   : > { %v1698_v42 = vpop.xlane.xlu1 %1697  ;;  %v1798_v4 = vsel %vm973_vm14, %v1797_v5, %v1793_v16 }
 0x354   : > { %v1666_v32 = vpop.xlane.xlu0 %1665  ;;  %v1881_v2 = vrot.slane %v1698_v42, %v2763_v61 }
 0x355   : > { %v1802_v55 = vrot.slane %v1666_v32, %v2763_v61  ;;  %v1572_v61 = vld [vmem:[#allocation4] sm:$0x3] }
 0x356   : > { %v1882_v18 = vsel %vm980_vm15, %v1881_v2, %v1877_v12  ;;  %v1573_v0 = vmul.f32 %v3002_v48, %v1572_v61 }
 0x357   : > { %v1700_v51 = vpop.xlane.xlu1 %1699  ;;  %v1803_v23 = vsel %vm980_vm15, %v1802_v55, %v1798_v4 }
 0x358   : > { %v1668_v56 = vpop.xlane.xlu0 %1667  ;;  %v1886_v3 = vrot.slane %v1700_v51, %v2760_v60 }
 0x359   : > { %v1807_v14 = vrot.slane %v1668_v56, %v2760_v60  ;;  %v1902_v60 = vld [vmem:[#allocation3] sm:$0x3] }
 0x35a   : > { %v1887_v39 = vsel %vm987_vm1, %v1886_v3, %v1882_v18  ;;  %2281 = vrcp.f32 %v1902_v60 }
 0x35b   : > { %v1702_v25 = vpop.xlane.xlu1 %1701  ;;  %v1808_v53 = vsel %vm987_vm1, %v1807_v14, %v1803_v23 }
 0x35c   : > { %v1891_v43 = vrot.slane %v1702_v25, %v2772_v46  ;;  %v1670_v30 = vpop.xlane.xlu0 %1669 }
 0x35d   : > { %v1812_v57 = vrot.slane %v1670_v30, %v2772_v46 }
 0x35e   : > { %v1892_v19 = vsel %vm994_vm2, %v1891_v43, %v1887_v39 }
 0x35f   : > { %v1813_v29 = vsel %vm994_vm2, %v1812_v57, %v1808_v53 }
 0x360   : > { %v1893_v15 = vsel %vm1075_vm0, %v1892_v19, %v1813_v29 }
 0x361   : > { %v1895_v21 = vadd.f32 %v1893_v15, %v1573_v0 }
 0x363   : > { %1896 = vst [vmem:[#allocation4] sm:$0x3] %v1895_v21 }
 0x364   : > { %v2282_v7 = vpop.eup %2281 }
 0x36a   : > { %v1901_v26 = vld [vmem:[#allocation4] sm:$0x3] }
 0x36b   : > { %v1904_v17 = vmul.f32 %v2282_v7, %v1901_v26 }
 0x36d   : > { %v1906_v46 = vsel %vm3175_vm3, %v1904_v17, 0.0 }
 0x36e   : > { %v1907_v44 = vrot.slane %v1906_v46, 4 }
 0x370   : > { %v1908_v62 = vadd.f32 %v1907_v44, %v1906_v46 }
 0x372   : > { %v1909_v58 = vrot.slane %v1908_v62, 2 }
 0x374   : > { %v1910_v48 = vadd.f32 %v1909_v58, %v1908_v62 }
 0x376   : > { %v1911_v37 = vrot.slane %v1910_v48, 1 }
 0x378   : > { %v1912_v10 = vadd.f32 %v1911_v37, %v1910_v48 }
 0x37a   : > { %v1915_v33 = vadd.f32 %v1914_v28, %v1912_v10 }
 0x37c   : > { %1916 = vst [vmem:[%s266_s27] sm:$0x1] %v1915_v33 }
 0x37d   : > { %2296 = shalt.err (!%p2293_p5)
}
 0x37e   : > { %s2297_s12 = scalar_lea.hbm %s3090_s7, 16  ;;  %s2301_s15 = scalar_lea.hbm %s3141_s4, 32 }
 0x37f   : > { %p2298_p6 = scmp.ne.s32.totalorder %s3090_s7, %s2297_s12  ;;  %p2302_p10 = scmp.lt.u32.totalorder %s3090_s7, %s3141_s4 }
 0x380   : > { %p2303_p11 = scmp.lt.u32.totalorder %s2301_s15, %s2297_s12  ;;  %p2305_p13 = scmp.lt.u32.totalorder %s2297_s12, %s3090_s7 }
 0x381   : > { %p2299_p7 = pnand %p2298_p6, %p2435_p4 }
 0x382   : > { %p2304_p12 = por %p2303_p11, %p2302_p10 }
 0x383   : > { %p2300_p9 = pneg %p2299_p7 }
 0x384   : > { %p2306_p0 = por %p2305_p13, %p2304_p12 }
 0x386   : > { %p2307_p1 = pnand %p2306_p0, %p2300_p9 }
 0x388   : > { %2310 = shalt.err (!%p2307_p1)
}
 0x389   : > { %2141 = dma.vmem_to_hbm [thread:$0]  (%p2435_p4), %s3092_s30, 16, %s3090_s7, %s1918_s8  }
 0x38a PF: > { %p2147_p2 = scmp.ge.s32.totalorder %s2361_s22, 2  ;;  %s1943_s23 = sand.u32 1, %s2341_s17  }
 0x38b   : > { %s1944_s25 = scalar_lea.sflag [#allocation7], %s1943_s23 }
 0x38c   : > { %p2144_p3 = pnand %p2147_p2, %p2442_p8 }
 0x38e   : > { %2336 = dma.done.wait (!%p2144_p3), %s1944_s25, 16  }
 0x38f   : > { %2338 = vsyncadd (!%p2144_p3), %s1944_s25, 4294967280  ;;  %s18_s22 = sadd.s32 1, %s2361_s22   ;;  %s3176_s17 = smov %s2345_s18 }
 0x390   : > { %p15_p5 = scmp.ge.s32.totalorder %s18_s22, 4   ;;  %s3177_s18 = smov %s2349_s19 }
 0x391   : > { %s3178_s19 = smov %s2448_s29  ;;  %s3179_s20 = smov %s2357_s21 }
 0x392   : > { %s3180_s21 = smov %s3182_s24  ;;  %17 = sbr.rel (!%p15_p5) target bundleno = 6 (0x6), region = 89 }
 0x399   :  { %1948 = vsyncpa [#allocation7], 1 }
 0x39a   :  { %1950 = vsyncpa [#allocation7 + $0x1], 1 }

</bundles_post_ra>
